<compile_context>
chip_gen: v7x
topology: tpu7x:2x2x1
jax: 0.10.0
libtpu: 0.0.40
codegen_flags: <defaults>
</compile_context>

<pallas_src>
import jax
import jax.numpy as jnp
import numpy as np
from jax.experimental import pallas as pl
from jax.experimental.pallas import tpu as pltpu

# ---------------- small, module-consistent configuration ----------------
BATCH = 2
TIME_LENS = 8
WINDOW = 10                       # window_size = sequence_lens // time_lens
SEQ_LENS = TIME_LENS * WINDOW     # 80
HIDDEN_CH = 64                    # SubConvNet hidden_channel
OUT_CH = 4                        # SubConvNet out_channel
K1, STRIDE1 = 4, 2                # first Conv1d(1, 64, kernel_size=4, stride=2)
L_OUT = (WINDOW - K1) // STRIDE1 + 1          # conv output length (=4)
INPUT_SIZE = OUT_CH * L_OUT                   # adaptive feature size (=16)
HIDDEN_SIZE = 32                  # LSTM hidden size (small stand-in for 256)
FEATURE_SIZE = 32                 # transform output size
N_WIN = BATCH * TIME_LENS         # number of conv windows (=16)


def _full_spec(shape):
    # BlockSpec covering the whole array (everything is VMEM resident).
    return pl.BlockSpec(shape, lambda i, _n=len(shape): (0,) * _n)


# ======================== fused SubFeatureNet kernel =======================
def fused_kernel(patch_ref, w1_ref, vec_ref, wres_ref, wfold_ref, lstm_ref,
                 out_ref):
    C = HIDDEN_CH
    N = N_WIN
    L = L_OUT
    H = HIDDEN_SIZE
    B = BATCH
    F = FEATURE_SIZE

    vec = vec_ref[...]                         # (8, 128) packed small vectors
    b1 = vec[0:1, 0:C]                         # conv1 bias           (1, 64)
    b_gx = vec[5:6, :]                         # folded LSTM-in bias  (1, 128)
    bt = vec[6:7, 0:F]                         # transform bias       (1, 32)

    # ----- Conv1d(1, C, k=4, stride=2): patches pre-im2col'd in wrapper -----
    # rows ordered (l, n) l-major with n = t*B + b (time-major windows).
    h = (jnp.dot(patch_ref[...], w1_ref[...],
                 preferred_element_type=jnp.float32) + b1)      # (L*N, C)

    zero_blk = jnp.zeros((N, C), jnp.float32)

    def conv3(t, ci):
        # Conv1d(C, C, k=3, pad=1) over l: rows are l-major, so +/-N rows is
        # +/-1 conv position.  Three accumulating K=C dots on tile-aligned row
        # slices of one zero-padded slab (no 192-lane concat / lane repack).
        pad = jnp.concatenate([zero_blk, t, zero_blk], axis=0)  # ((L+2)*N, C)
        out = jnp.dot(pad[0:L * N, :], wres_ref[3 * ci + 0],
                      preferred_element_type=jnp.float32)       # tap l-1
        out = out + jnp.dot(t, wres_ref[3 * ci + 1],
                            preferred_element_type=jnp.float32)  # tap l
        out = out + jnp.dot(pad[2 * N:(L + 2) * N, :], wres_ref[3 * ci + 2],
                            preferred_element_type=jnp.float32)  # tap l+1
        return out

    # two ResidualBlock1d: BN -> ReLU -> conv3 -> BN -> ReLU -> conv3 (+ skip)
    for blk in range(2):
        sc = vec[1 + 2 * blk:2 + 2 * blk, 0:C]          # BN scale (eval mode)
        sh = vec[1 + 2 * blk:2 + 2 * blk, C:2 * C]      # BN shift
        t = jnp.maximum(h * sc + sh, 0.0)
        t = conv3(t, 2 * blk)
        sc = vec[2 + 2 * blk:3 + 2 * blk, 0:C]
        sh = vec[2 + 2 * blk:3 + 2 * blk, C:2 * C]
        t = jnp.maximum(t * sc + sh, 0.0)
        t = conv3(t, 2 * blk + 1)
        h = h + t

    # ----- conb 1x1 conv + channel-major flatten + LSTM input projection -----
    # all folded into wfold[l] at init time; covers ALL timesteps at once.
    gx = b_gx                                                   # (1, 4H)
    for l in range(L):
        gx = gx + jnp.dot(h[l * N:(l + 1) * N, :], wfold_ref[l],
                          preferred_element_type=jnp.float32)   # (N, 4H)

    # ----------- LSTM recurrence (fully unrolled, data resident) ------------
    # gate order (i, f, o | g); sigmoid lanes were pre-scaled by 0.5 at init,
    # so ONE tanh per step + a per-lane affine recovers all four gates.
    whh = lstm_ref[0:H, :]                                      # (H, 4H)
    wt = lstm_ref[H:2 * H, 0:F]                                 # (H, F)
    lane = jax.lax.broadcasted_iota(jnp.int32, (1, 4 * H), 1)
    act_scale = jnp.where(lane < 3 * H, 0.5, 1.0)
    act_shift = jnp.where(lane < 3 * H, 0.5, 0.0)

    h_t = jnp.zeros((B, H), jnp.float32)
    c_t = jnp.zeros((B, H), jnp.float32)
    for step in range(TIME_LENS):
        xg = gx[step * B:(step + 1) * B, :]                     # static (B,4H)
        gates = xg + jnp.dot(h_t, whh, preferred_element_type=jnp.float32)
        act = jnp.tanh(gates) * act_scale + act_shift   # sig(i,f,o) | tanh(g)
        i_g = act[:, 0:H]
        f_g = act[:, H:2 * H]
        o_g = act[:, 2 * H:3 * H]
        g_g = act[:, 3 * H:4 * H]
        c_t = f_g * c_t + i_g * g_g
        h_t = o_g * jnp.tanh(c_t)

    # --------------------- transform: tanh(Linear(h_T)) ---------------------
    out_ref[...] = jnp.tanh(
        jnp.dot(h_t, wt, preferred_element_type=jnp.float32) + bt)


def sub_feature_net_forward(x, p):
    # x: (BATCH, 1, SEQ_LENS) -- mirrors the PyTorch NCW input.
    # chunk-along-seq + stack-over-time, laid out TIME-major (row = t*B + b),
    # plus the first-layer im2col, all as cheap XLA glue that fuses with the
    # reshape; everything else runs inside one VMEM-resident pallas_call.
    xw = x.reshape(BATCH, TIME_LENS, WINDOW).transpose(1, 0, 2) \
          .reshape(N_WIN, WINDOW)
    idx = STRIDE1 * jnp.arange(L_OUT)[:, None] + jnp.arange(K1)[None, :]
    patches = xw[:, idx].transpose(1, 0, 2).reshape(L_OUT * N_WIN, K1)

    args = (patches, p['w1_t'], p['vec_slab'], p['wres_taps'], p['wfold'],
            p['lstm_slab'])
    return pl.pallas_call(
        fused_kernel,
        out_shape=jax.ShapeDtypeStruct((BATCH, FEATURE_SIZE), jnp.float32),
        grid_spec=pltpu.PrefetchScalarGridSpec(
            num_scalar_prefetch=0,
            grid=(1,),
            in_specs=[_full_spec(a.shape) for a in args],
            out_specs=pl.BlockSpec((BATCH, FEATURE_SIZE), lambda i: (0, 0)),
        ),
        compiler_params=pltpu.CompilerParams(
            dimension_semantics=("arbitrary",)),
    )(*args)


# ============================== parameters =================================
def init_params(key):
    ks = jax.random.split(key, 20)
    rnd = lambda k, shape, s=0.1: s * jax.random.normal(k, shape, jnp.float32)
    H = HIDDEN_SIZE
    C = HIDDEN_CH
    L = L_OUT

    p = {}
    # SubConvNet (torch-layout parameters, used by the pure-JAX reference)
    p['w1'] = rnd(ks[0], (C, 1, K1))                # Conv1d(1,64,4,2) weight
    p['b1'] = rnd(ks[1], (C,))
    p['wres'] = jnp.stack([rnd(ks[2 + i], (C, C, 3), 0.05)
                           for i in range(4)])      # 4 x Conv1d(64,64,3,p=1)
    gamma = 1.0 + rnd(ks[6], (4, C))
    beta = rnd(ks[7], (4, C))
    rmean = rnd(ks[8], (4, C))
    rvar = 1.0 + jnp.abs(rnd(ks[9], (4, C)))
    p['bn_scale'] = gamma / jnp.sqrt(rvar + 1e-5)   # eval-mode BN folded
    p['bn_shift'] = beta - rmean * p['bn_scale']
    p['wcb'] = rnd(ks[10], (OUT_CH, C, 1))          # conb Conv1d(64,4,1)
    p['bcb'] = rnd(ks[11], (OUT_CH,))
    # LSTM (single layer, unidirectional, torch gate order i,f,g,o)
    p['w_ih'] = rnd(ks[12], (4 * H, INPUT_SIZE))
    p['w_hh'] = rnd(ks[13], (4 * H, H))
    p['b_ih'] = rnd(ks[14], (4 * H,))
    p['b_hh'] = rnd(ks[15], (4 * H,))
    # transform Linear(H, FEATURE_SIZE)
    p['w_t'] = rnd(ks[16], (FEATURE_SIZE, H))
    p['b_t'] = rnd(ks[17], (FEATURE_SIZE,))

    # ------------------- kernel-layout / folded parameters ------------------
    p['w1_t'] = p['w1'][:, 0, :].T                              # (K1, C)
    # residual conv taps: (4, C_out, C_in, 3) -> (12, C_in, C_out); the kernel
    # indexes tap k of residual-conv i as wres_taps[3*i + k].
    p['wres_taps'] = jnp.transpose(p['wres'], (0, 3, 2, 1)).reshape(12, C, C)

    wcb_t = p['wcb'][:, :, 0].T                                 # (C, OUT_CH)
    bcb_r = p['bcb'].reshape(1, -1)                             # (1, OUT_CH)

    def regroup_gates(w):
        # torch gate order (i, f, g, o) -> kernel order (i, f, o, g) on the
        # last axis (sigmoid lanes contiguous in [0:3H], tanh lane in [3H:4H]).
        return jnp.concatenate([w[..., :2 * H], w[..., 3 * H:4 * H],
                                w[..., 2 * H:3 * H]], axis=-1)

    wih_g = regroup_gates(p['w_ih'].T)                          # (I, 4H)
    whh_g = regroup_gates(p['w_hh'].T)                          # (H, 4H)
    b_g = regroup_gates((p['b_ih'] + p['b_hh']).reshape(1, -1))  # (1, 4H)

    # split w_ih rows by conv position l (feature index = c*L + l), then fold
    # the conb 1x1 conv + channel-major flatten into the input projection:
    #   wfold[l] = wcb_t @ wih_l[l];   b_gx = b + sum_l bcb @ wih_l[l]
    wih_l = jnp.stack([wih_g[l::L, :] for l in range(L)])       # (L, OUT_CH, 4H)
    wfold = jnp.einsum('co,lof->lcf', wcb_t, wih_l)             # (L, C, 4H)
    b_gx = b_g + jnp.einsum('xo,lof->xf', bcb_r, wih_l)         # (1, 4H)

    # sigmoid lanes (i, f, o = first 3H) are evaluated as 0.5*tanh(x/2)+0.5 in
    # the kernel, so pre-scale their pre-activation weights/bias by 0.5 here.
    gate_scale = jnp.concatenate([jnp.full((3 * H,), 0.5, jnp.float32),
                                  jnp.ones((H,), jnp.float32)])
    p['wfold'] = wfold * gate_scale
    b_gx = b_gx * gate_scale
    whh_s = whh_g * gate_scale

    # all small vectors packed into a single (8, 128) tile (one startup DMA):
    #   row 0: conv1 bias | rows 1-4: [bn_scale_i | bn_shift_i]
    #   row 5: folded LSTM input bias (pre-scaled) | row 6: transform bias
    vec = jnp.zeros((8, 128), jnp.float32)
    vec = vec.at[0, 0:C].set(p['b1'])
    vec = vec.at[1:5, 0:C].set(p['bn_scale'])
    vec = vec.at[1:5, C:2 * C].set(p['bn_shift'])
    vec = vec.at[5, :].set(b_gx[0])
    vec = vec.at[6, 0:FEATURE_SIZE].set(p['b_t'])
    p['vec_slab'] = vec

    # LSTM recurrent weight (pre-scaled) + transform weight in one (2H, 128):
    lstm = jnp.zeros((2 * H, 4 * H), jnp.float32)
    lstm = lstm.at[0:H, :].set(whh_s)
    lstm = lstm.at[H:2 * H, 0:FEATURE_SIZE].set(p['w_t'].T)
    p['lstm_slab'] = lstm
    return p


# ======================= pure-JAX reference (check) ========================
def reference_forward(x, p):
    b = x.shape[0]
    H = HIDDEN_SIZE
    windows = x.reshape(b * TIME_LENS, WINDOW)
    idx = STRIDE1 * jnp.arange(L_OUT)[:, None] + jnp.arange(K1)[None, :]
    patches = windows[:, idx]                                   # (N, L, K1)
    h = (jnp.einsum('nlk,ck->ncl', patches, p['w1'][:, 0, :])
         + p['b1'][None, :, None])

    def bn(y, i):
        return (y * p['bn_scale'][i][None, :, None]
                + p['bn_shift'][i][None, :, None])

    def conv3(y, w):
        yp = jnp.pad(y, ((0, 0), (0, 0), (1, 1)))
        out = 0.0
        for k in range(3):
            out = out + jnp.einsum('ncl,dc->ndl', yp[:, :, k:k + L_OUT],
                                   w[:, :, k])
        return out

    for blk in range(2):
        t = jax.nn.relu(bn(h, 2 * blk))
        t = conv3(t, p['wres'][2 * blk])
        t = jax.nn.relu(bn(t, 2 * blk + 1))
        t = conv3(t, p['wres'][2 * blk + 1])
        h = h + t

    h = (jnp.einsum('ncl,dc->ndl', h, p['wcb'][:, :, 0])
         + p['bcb'][None, :, None])
    feat = h.reshape(N_WIN, INPUT_SIZE)
    feat = feat.reshape(b, TIME_LENS, INPUT_SIZE).transpose(1, 0, 2)

    h_t = jnp.zeros((b, H), jnp.float32)
    c_t = jnp.zeros((b, H), jnp.float32)
    for step in range(TIME_LENS):
        g = (feat[step] @ p['w_ih'].T + h_t @ p['w_hh'].T
             + p['b_ih'] + p['b_hh'])
        i_g = jax.nn.sigmoid(g[:, 0:H])
        f_g = jax.nn.sigmoid(g[:, H:2 * H])
        g_g = jnp.tanh(g[:, 2 * H:3 * H])
        o_g = jax.nn.sigmoid(g[:, 3 * H:4 * H])
        c_t = f_g * c_t + i_g * g_g
        h_t = o_g * jnp.tanh(c_t)
    return jnp.tanh(h_t @ p['w_t'].T + p['b_t'])


# =================================== main ==================================
if __name__ == "__main__":
    key = jax.random.PRNGKey(0)
    k_param, k_x = jax.random.split(key)
    params = init_params(k_param)
    x = jax.random.normal(k_x, (BATCH, 1, SEQ_LENS), jnp.float32)

    out = sub_feature_net_forward(x, params)
    out = jax.block_until_ready(out)

    ref = reference_forward(x, params)
    np.testing.assert_allclose(np.asarray(out), np.asarray(ref),
                               rtol=1e-4, atol=1e-4)
    assert out.shape == (BATCH, FEATURE_SIZE)
    print("KERNEL_OK")
</pallas_src>

<mosaic_0001>
module attributes {stable_mosaic.version = 11 : i64} {
  func.func @fused_kernel(%arg0: i32, %arg1: memref<64x4xf32, #tpu.memory_space<vmem>>, %arg2: memref<4x64xf32, #tpu.memory_space<vmem>>, %arg3: memref<8x128xf32, #tpu.memory_space<vmem>>, %arg4: memref<12x64x64xf32, #tpu.memory_space<vmem>>, %arg5: memref<4x64x128xf32, #tpu.memory_space<vmem>>, %arg6: memref<64x128xf32, #tpu.memory_space<vmem>>, %arg7: memref<2x32xf32, #tpu.memory_space<vmem>>) attributes {dimension_semantics = [#tpu.dimension_semantics<arbitrary>], iteration_bounds = array<i64: 1>, scalar_prefetch = 0 : i64, scratch_operands = 0 : i64, tpu.core_type = #tpu.core_type<tc>, window_params = [{pipeline_mode = #tpu.pipeline_mode<synchronous>, transform_indices = @transform_0, window_bounds = array<i64: 64, 4>}, {pipeline_mode = #tpu.pipeline_mode<synchronous>, transform_indices = @transform_1, window_bounds = array<i64: 4, 64>}, {pipeline_mode = #tpu.pipeline_mode<synchronous>, transform_indices = @transform_2, window_bounds = array<i64: 8, 128>}, {pipeline_mode = #tpu.pipeline_mode<synchronous>, transform_indices = @transform_3, window_bounds = array<i64: 12, 64, 64>}, {pipeline_mode = #tpu.pipeline_mode<synchronous>, transform_indices = @transform_4, window_bounds = array<i64: 4, 64, 128>}, {pipeline_mode = #tpu.pipeline_mode<synchronous>, transform_indices = @transform_5, window_bounds = array<i64: 64, 128>}, {pipeline_mode = #tpu.pipeline_mode<synchronous>, transform_indices = @transform_6, window_bounds = array<i64: 2, 32>}]} {
    %c0 = arith.constant 0 : index
    %c0_0 = arith.constant 0 : index
    %0 = vector.load %arg3[%c0, %c0_0] : memref<8x128xf32, #tpu.memory_space<vmem>>, vector<8x128xf32>
    %1 = vector.extract_strided_slice %0 {offsets = [0, 0], sizes = [1, 64], strides = [1, 1]} : vector<8x128xf32> to vector<1x64xf32>
    %2 = vector.extract_strided_slice %0 {offsets = [5, 0], sizes = [1, 128], strides = [1, 1]} : vector<8x128xf32> to vector<1x128xf32>
    %3 = vector.extract_strided_slice %0 {offsets = [6, 0], sizes = [1, 32], strides = [1, 1]} : vector<8x128xf32> to vector<1x32xf32>
    %c0_1 = arith.constant 0 : index
    %c0_2 = arith.constant 0 : index
    %4 = vector.load %arg1[%c0_1, %c0_2] : memref<64x4xf32, #tpu.memory_space<vmem>>, vector<64x4xf32>
    %c0_3 = arith.constant 0 : index
    %c0_4 = arith.constant 0 : index
    %5 = vector.load %arg2[%c0_3, %c0_4] : memref<4x64xf32, #tpu.memory_space<vmem>>, vector<4x64xf32>
    %cst = arith.constant dense<0.000000e+00> : vector<64x64xf32>
    %6 = tpu.matmul %4, %5, %cst {dimension_numbers = #tpu.dot_dimension_numbers<[1], [0], [0], [1], [0, 0, 1, 1], [], []>} : vector<64x4xf32>, vector<4x64xf32>, vector<64x64xf32> -> vector<64x64xf32>
    %7 = vector.broadcast %1 : vector<1x64xf32> to vector<64x64xf32>
    %8 = arith.addf %6, %7 : vector<64x64xf32>
    %cst_5 = arith.constant 0.000000e+00 : f32
    %9 = vector.broadcast %cst_5 : f32 to vector<16x64xf32>
    %10 = vector.extract_strided_slice %0 {offsets = [1, 0], sizes = [1, 64], strides = [1, 1]} : vector<8x128xf32> to vector<1x64xf32>
    %11 = vector.extract_strided_slice %0 {offsets = [1, 64], sizes = [1, 64], strides = [1, 1]} : vector<8x128xf32> to vector<1x64xf32>
    %12 = vector.broadcast %10 : vector<1x64xf32> to vector<64x64xf32>
    %13 = arith.mulf %8, %12 : vector<64x64xf32>
    %14 = vector.broadcast %11 : vector<1x64xf32> to vector<64x64xf32>
    %15 = arith.addf %13, %14 : vector<64x64xf32>
    %cst_6 = arith.constant 0.000000e+00 : f32
    %16 = vector.broadcast %cst_6 : f32 to vector<64x64xf32>
    %17 = arith.maximumf %15, %16 : vector<64x64xf32>
    %18 = tpu.concatenate %9, %17, %9 in 0 : vector<16x64xf32>, vector<64x64xf32>, vector<16x64xf32> -> vector<96x64xf32>
    %19 = vector.extract_strided_slice %18 {offsets = [0, 0], sizes = [64, 64], strides = [1, 1]} : vector<96x64xf32> to vector<64x64xf32>
    %c0_7 = arith.constant 0 : index
    %c0_8 = arith.constant 0 : index
    %c0_9 = arith.constant 0 : index
    %20 = vector.load %arg4[%c0_7, %c0_8, %c0_9] : memref<12x64x64xf32, #tpu.memory_space<vmem>>, vector<1x64x64xf32>
    %21 = vector.shape_cast %20 : vector<1x64x64xf32> to vector<64x64xf32>
    %cst_10 = arith.constant dense<0.000000e+00> : vector<64x64xf32>
    %22 = tpu.matmul %19, %21, %cst_10 {dimension_numbers = #tpu.dot_dimension_numbers<[1], [0], [0], [1], [0, 0, 1, 1], [], []>} : vector<64x64xf32>, vector<64x64xf32>, vector<64x64xf32> -> vector<64x64xf32>
    %c1 = arith.constant 1 : index
    %c0_11 = arith.constant 0 : index
    %c0_12 = arith.constant 0 : index
    %23 = vector.load %arg4[%c1, %c0_11, %c0_12] : memref<12x64x64xf32, #tpu.memory_space<vmem>>, vector<1x64x64xf32>
    %24 = vector.shape_cast %23 : vector<1x64x64xf32> to vector<64x64xf32>
    %cst_13 = arith.constant dense<0.000000e+00> : vector<64x64xf32>
    %25 = tpu.matmul %17, %24, %cst_13 {dimension_numbers = #tpu.dot_dimension_numbers<[1], [0], [0], [1], [0, 0, 1, 1], [], []>} : vector<64x64xf32>, vector<64x64xf32>, vector<64x64xf32> -> vector<64x64xf32>
    %26 = arith.addf %22, %25 : vector<64x64xf32>
    %27 = vector.extract_strided_slice %18 {offsets = [32, 0], sizes = [64, 64], strides = [1, 1]} : vector<96x64xf32> to vector<64x64xf32>
    %c2 = arith.constant 2 : index
    %c0_14 = arith.constant 0 : index
    %c0_15 = arith.constant 0 : index
    %28 = vector.load %arg4[%c2, %c0_14, %c0_15] : memref<12x64x64xf32, #tpu.memory_space<vmem>>, vector<1x64x64xf32>
    %29 = vector.shape_cast %28 : vector<1x64x64xf32> to vector<64x64xf32>
    %cst_16 = arith.constant dense<0.000000e+00> : vector<64x64xf32>
    %30 = tpu.matmul %27, %29, %cst_16 {dimension_numbers = #tpu.dot_dimension_numbers<[1], [0], [0], [1], [0, 0, 1, 1], [], []>} : vector<64x64xf32>, vector<64x64xf32>, vector<64x64xf32> -> vector<64x64xf32>
    %31 = arith.addf %26, %30 : vector<64x64xf32>
    %32 = vector.extract_strided_slice %0 {offsets = [2, 0], sizes = [1, 64], strides = [1, 1]} : vector<8x128xf32> to vector<1x64xf32>
    %33 = vector.extract_strided_slice %0 {offsets = [2, 64], sizes = [1, 64], strides = [1, 1]} : vector<8x128xf32> to vector<1x64xf32>
    %34 = vector.broadcast %32 : vector<1x64xf32> to vector<64x64xf32>
    %35 = arith.mulf %31, %34 : vector<64x64xf32>
    %36 = vector.broadcast %33 : vector<1x64xf32> to vector<64x64xf32>
    %37 = arith.addf %35, %36 : vector<64x64xf32>
    %cst_17 = arith.constant 0.000000e+00 : f32
    %38 = vector.broadcast %cst_17 : f32 to vector<64x64xf32>
    %39 = arith.maximumf %37, %38 : vector<64x64xf32>
    %40 = tpu.concatenate %9, %39, %9 in 0 : vector<16x64xf32>, vector<64x64xf32>, vector<16x64xf32> -> vector<96x64xf32>
    %41 = vector.extract_strided_slice %40 {offsets = [0, 0], sizes = [64, 64], strides = [1, 1]} : vector<96x64xf32> to vector<64x64xf32>
    %c3 = arith.constant 3 : index
    %c0_18 = arith.constant 0 : index
    %c0_19 = arith.constant 0 : index
    %42 = vector.load %arg4[%c3, %c0_18, %c0_19] : memref<12x64x64xf32, #tpu.memory_space<vmem>>, vector<1x64x64xf32>
    %43 = vector.shape_cast %42 : vector<1x64x64xf32> to vector<64x64xf32>
    %cst_20 = arith.constant dense<0.000000e+00> : vector<64x64xf32>
    %44 = tpu.matmul %41, %43, %cst_20 {dimension_numbers = #tpu.dot_dimension_numbers<[1], [0], [0], [1], [0, 0, 1, 1], [], []>} : vector<64x64xf32>, vector<64x64xf32>, vector<64x64xf32> -> vector<64x64xf32>
    %c4 = arith.constant 4 : index
    %c0_21 = arith.constant 0 : index
    %c0_22 = arith.constant 0 : index
    %45 = vector.load %arg4[%c4, %c0_21, %c0_22] : memref<12x64x64xf32, #tpu.memory_space<vmem>>, vector<1x64x64xf32>
    %46 = vector.shape_cast %45 : vector<1x64x64xf32> to vector<64x64xf32>
    %cst_23 = arith.constant dense<0.000000e+00> : vector<64x64xf32>
    %47 = tpu.matmul %39, %46, %cst_23 {dimension_numbers = #tpu.dot_dimension_numbers<[1], [0], [0], [1], [0, 0, 1, 1], [], []>} : vector<64x64xf32>, vector<64x64xf32>, vector<64x64xf32> -> vector<64x64xf32>
    %48 = arith.addf %44, %47 : vector<64x64xf32>
    %49 = vector.extract_strided_slice %40 {offsets = [32, 0], sizes = [64, 64], strides = [1, 1]} : vector<96x64xf32> to vector<64x64xf32>
    %c5 = arith.constant 5 : index
    %c0_24 = arith.constant 0 : index
    %c0_25 = arith.constant 0 : index
    %50 = vector.load %arg4[%c5, %c0_24, %c0_25] : memref<12x64x64xf32, #tpu.memory_space<vmem>>, vector<1x64x64xf32>
    %51 = vector.shape_cast %50 : vector<1x64x64xf32> to vector<64x64xf32>
    %cst_26 = arith.constant dense<0.000000e+00> : vector<64x64xf32>
    %52 = tpu.matmul %49, %51, %cst_26 {dimension_numbers = #tpu.dot_dimension_numbers<[1], [0], [0], [1], [0, 0, 1, 1], [], []>} : vector<64x64xf32>, vector<64x64xf32>, vector<64x64xf32> -> vector<64x64xf32>
    %53 = arith.addf %48, %52 : vector<64x64xf32>
    %54 = arith.addf %8, %53 : vector<64x64xf32>
    %55 = vector.extract_strided_slice %0 {offsets = [3, 0], sizes = [1, 64], strides = [1, 1]} : vector<8x128xf32> to vector<1x64xf32>
    %56 = vector.extract_strided_slice %0 {offsets = [3, 64], sizes = [1, 64], strides = [1, 1]} : vector<8x128xf32> to vector<1x64xf32>
    %57 = vector.broadcast %55 : vector<1x64xf32> to vector<64x64xf32>
    %58 = arith.mulf %54, %57 : vector<64x64xf32>
    %59 = vector.broadcast %56 : vector<1x64xf32> to vector<64x64xf32>
    %60 = arith.addf %58, %59 : vector<64x64xf32>
    %cst_27 = arith.constant 0.000000e+00 : f32
    %61 = vector.broadcast %cst_27 : f32 to vector<64x64xf32>
    %62 = arith.maximumf %60, %61 : vector<64x64xf32>
    %63 = tpu.concatenate %9, %62, %9 in 0 : vector<16x64xf32>, vector<64x64xf32>, vector<16x64xf32> -> vector<96x64xf32>
    %64 = vector.extract_strided_slice %63 {offsets = [0, 0], sizes = [64, 64], strides = [1, 1]} : vector<96x64xf32> to vector<64x64xf32>
    %c6 = arith.constant 6 : index
    %c0_28 = arith.constant 0 : index
    %c0_29 = arith.constant 0 : index
    %65 = vector.load %arg4[%c6, %c0_28, %c0_29] : memref<12x64x64xf32, #tpu.memory_space<vmem>>, vector<1x64x64xf32>
    %66 = vector.shape_cast %65 : vector<1x64x64xf32> to vector<64x64xf32>
    %cst_30 = arith.constant dense<0.000000e+00> : vector<64x64xf32>
    %67 = tpu.matmul %64, %66, %cst_30 {dimension_numbers = #tpu.dot_dimension_numbers<[1], [0], [0], [1], [0, 0, 1, 1], [], []>} : vector<64x64xf32>, vector<64x64xf32>, vector<64x64xf32> -> vector<64x64xf32>
    %c7 = arith.constant 7 : index
    %c0_31 = arith.constant 0 : index
    %c0_32 = arith.constant 0 : index
    %68 = vector.load %arg4[%c7, %c0_31, %c0_32] : memref<12x64x64xf32, #tpu.memory_space<vmem>>, vector<1x64x64xf32>
    %69 = vector.shape_cast %68 : vector<1x64x64xf32> to vector<64x64xf32>
    %cst_33 = arith.constant dense<0.000000e+00> : vector<64x64xf32>
    %70 = tpu.matmul %62, %69, %cst_33 {dimension_numbers = #tpu.dot_dimension_numbers<[1], [0], [0], [1], [0, 0, 1, 1], [], []>} : vector<64x64xf32>, vector<64x64xf32>, vector<64x64xf32> -> vector<64x64xf32>
    %71 = arith.addf %67, %70 : vector<64x64xf32>
    %72 = vector.extract_strided_slice %63 {offsets = [32, 0], sizes = [64, 64], strides = [1, 1]} : vector<96x64xf32> to vector<64x64xf32>
    %c8 = arith.constant 8 : index
    %c0_34 = arith.constant 0 : index
    %c0_35 = arith.constant 0 : index
    %73 = vector.load %arg4[%c8, %c0_34, %c0_35] : memref<12x64x64xf32, #tpu.memory_space<vmem>>, vector<1x64x64xf32>
    %74 = vector.shape_cast %73 : vector<1x64x64xf32> to vector<64x64xf32>
    %cst_36 = arith.constant dense<0.000000e+00> : vector<64x64xf32>
    %75 = tpu.matmul %72, %74, %cst_36 {dimension_numbers = #tpu.dot_dimension_numbers<[1], [0], [0], [1], [0, 0, 1, 1], [], []>} : vector<64x64xf32>, vector<64x64xf32>, vector<64x64xf32> -> vector<64x64xf32>
    %76 = arith.addf %71, %75 : vector<64x64xf32>
    %77 = vector.extract_strided_slice %0 {offsets = [4, 0], sizes = [1, 64], strides = [1, 1]} : vector<8x128xf32> to vector<1x64xf32>
    %78 = vector.extract_strided_slice %0 {offsets = [4, 64], sizes = [1, 64], strides = [1, 1]} : vector<8x128xf32> to vector<1x64xf32>
    %79 = vector.broadcast %77 : vector<1x64xf32> to vector<64x64xf32>
    %80 = arith.mulf %76, %79 : vector<64x64xf32>
    %81 = vector.broadcast %78 : vector<1x64xf32> to vector<64x64xf32>
    %82 = arith.addf %80, %81 : vector<64x64xf32>
    %cst_37 = arith.constant 0.000000e+00 : f32
    %83 = vector.broadcast %cst_37 : f32 to vector<64x64xf32>
    %84 = arith.maximumf %82, %83 : vector<64x64xf32>
    %85 = tpu.concatenate %9, %84, %9 in 0 : vector<16x64xf32>, vector<64x64xf32>, vector<16x64xf32> -> vector<96x64xf32>
    %86 = vector.extract_strided_slice %85 {offsets = [0, 0], sizes = [64, 64], strides = [1, 1]} : vector<96x64xf32> to vector<64x64xf32>
    %c9 = arith.constant 9 : index
    %c0_38 = arith.constant 0 : index
    %c0_39 = arith.constant 0 : index
    %87 = vector.load %arg4[%c9, %c0_38, %c0_39] : memref<12x64x64xf32, #tpu.memory_space<vmem>>, vector<1x64x64xf32>
    %88 = vector.shape_cast %87 : vector<1x64x64xf32> to vector<64x64xf32>
    %cst_40 = arith.constant dense<0.000000e+00> : vector<64x64xf32>
    %89 = tpu.matmul %86, %88, %cst_40 {dimension_numbers = #tpu.dot_dimension_numbers<[1], [0], [0], [1], [0, 0, 1, 1], [], []>} : vector<64x64xf32>, vector<64x64xf32>, vector<64x64xf32> -> vector<64x64xf32>
    %c10 = arith.constant 10 : index
    %c0_41 = arith.constant 0 : index
    %c0_42 = arith.constant 0 : index
    %90 = vector.load %arg4[%c10, %c0_41, %c0_42] : memref<12x64x64xf32, #tpu.memory_space<vmem>>, vector<1x64x64xf32>
    %91 = vector.shape_cast %90 : vector<1x64x64xf32> to vector<64x64xf32>
    %cst_43 = arith.constant dense<0.000000e+00> : vector<64x64xf32>
    %92 = tpu.matmul %84, %91, %cst_43 {dimension_numbers = #tpu.dot_dimension_numbers<[1], [0], [0], [1], [0, 0, 1, 1], [], []>} : vector<64x64xf32>, vector<64x64xf32>, vector<64x64xf32> -> vector<64x64xf32>
    %93 = arith.addf %89, %92 : vector<64x64xf32>
    %94 = vector.extract_strided_slice %85 {offsets = [32, 0], sizes = [64, 64], strides = [1, 1]} : vector<96x64xf32> to vector<64x64xf32>
    %c11 = arith.constant 11 : index
    %c0_44 = arith.constant 0 : index
    %c0_45 = arith.constant 0 : index
    %95 = vector.load %arg4[%c11, %c0_44, %c0_45] : memref<12x64x64xf32, #tpu.memory_space<vmem>>, vector<1x64x64xf32>
    %96 = vector.shape_cast %95 : vector<1x64x64xf32> to vector<64x64xf32>
    %cst_46 = arith.constant dense<0.000000e+00> : vector<64x64xf32>
    %97 = tpu.matmul %94, %96, %cst_46 {dimension_numbers = #tpu.dot_dimension_numbers<[1], [0], [0], [1], [0, 0, 1, 1], [], []>} : vector<64x64xf32>, vector<64x64xf32>, vector<64x64xf32> -> vector<64x64xf32>
    %98 = arith.addf %93, %97 : vector<64x64xf32>
    %99 = arith.addf %54, %98 : vector<64x64xf32>
    %100 = vector.extract_strided_slice %99 {offsets = [0, 0], sizes = [16, 64], strides = [1, 1]} : vector<64x64xf32> to vector<16x64xf32>
    %c0_47 = arith.constant 0 : index
    %c0_48 = arith.constant 0 : index
    %c0_49 = arith.constant 0 : index
    %101 = vector.load %arg5[%c0_47, %c0_48, %c0_49] : memref<4x64x128xf32, #tpu.memory_space<vmem>>, vector<1x64x128xf32>
    %102 = vector.shape_cast %101 : vector<1x64x128xf32> to vector<64x128xf32>
    %cst_50 = arith.constant dense<0.000000e+00> : vector<16x128xf32>
    %103 = tpu.matmul %100, %102, %cst_50 {dimension_numbers = #tpu.dot_dimension_numbers<[1], [0], [0], [1], [0, 0, 1, 1], [], []>} : vector<16x64xf32>, vector<64x128xf32>, vector<16x128xf32> -> vector<16x128xf32>
    %104 = vector.broadcast %2 : vector<1x128xf32> to vector<16x128xf32>
    %105 = arith.addf %104, %103 : vector<16x128xf32>
    %106 = vector.extract_strided_slice %99 {offsets = [16, 0], sizes = [16, 64], strides = [1, 1]} : vector<64x64xf32> to vector<16x64xf32>
    %c1_51 = arith.constant 1 : index
    %c0_52 = arith.constant 0 : index
    %c0_53 = arith.constant 0 : index
    %107 = vector.load %arg5[%c1_51, %c0_52, %c0_53] : memref<4x64x128xf32, #tpu.memory_space<vmem>>, vector<1x64x128xf32>
    %108 = vector.shape_cast %107 : vector<1x64x128xf32> to vector<64x128xf32>
    %cst_54 = arith.constant dense<0.000000e+00> : vector<16x128xf32>
    %109 = tpu.matmul %106, %108, %cst_54 {dimension_numbers = #tpu.dot_dimension_numbers<[1], [0], [0], [1], [0, 0, 1, 1], [], []>} : vector<16x64xf32>, vector<64x128xf32>, vector<16x128xf32> -> vector<16x128xf32>
    %110 = arith.addf %105, %109 : vector<16x128xf32>
    %111 = vector.extract_strided_slice %99 {offsets = [32, 0], sizes = [16, 64], strides = [1, 1]} : vector<64x64xf32> to vector<16x64xf32>
    %c2_55 = arith.constant 2 : index
    %c0_56 = arith.constant 0 : index
    %c0_57 = arith.constant 0 : index
    %112 = vector.load %arg5[%c2_55, %c0_56, %c0_57] : memref<4x64x128xf32, #tpu.memory_space<vmem>>, vector<1x64x128xf32>
    %113 = vector.shape_cast %112 : vector<1x64x128xf32> to vector<64x128xf32>
    %cst_58 = arith.constant dense<0.000000e+00> : vector<16x128xf32>
    %114 = tpu.matmul %111, %113, %cst_58 {dimension_numbers = #tpu.dot_dimension_numbers<[1], [0], [0], [1], [0, 0, 1, 1], [], []>} : vector<16x64xf32>, vector<64x128xf32>, vector<16x128xf32> -> vector<16x128xf32>
    %115 = arith.addf %110, %114 : vector<16x128xf32>
    %116 = vector.extract_strided_slice %99 {offsets = [48, 0], sizes = [16, 64], strides = [1, 1]} : vector<64x64xf32> to vector<16x64xf32>
    %c3_59 = arith.constant 3 : index
    %c0_60 = arith.constant 0 : index
    %c0_61 = arith.constant 0 : index
    %117 = vector.load %arg5[%c3_59, %c0_60, %c0_61] : memref<4x64x128xf32, #tpu.memory_space<vmem>>, vector<1x64x128xf32>
    %118 = vector.shape_cast %117 : vector<1x64x128xf32> to vector<64x128xf32>
    %cst_62 = arith.constant dense<0.000000e+00> : vector<16x128xf32>
    %119 = tpu.matmul %116, %118, %cst_62 {dimension_numbers = #tpu.dot_dimension_numbers<[1], [0], [0], [1], [0, 0, 1, 1], [], []>} : vector<16x64xf32>, vector<64x128xf32>, vector<16x128xf32> -> vector<16x128xf32>
    %120 = arith.addf %115, %119 : vector<16x128xf32>
    %c0_63 = arith.constant 0 : index
    %c0_64 = arith.constant 0 : index
    %121 = vector.load %arg6[%c0_63, %c0_64] : memref<64x128xf32, #tpu.memory_space<vmem>>, vector<32x128xf32>
    %c32 = arith.constant 32 : index
    %c0_65 = arith.constant 0 : index
    %122 = vector.load %arg6[%c32, %c0_65] : memref<64x128xf32, #tpu.memory_space<vmem>>, vector<32x32xf32>
    %123 = tpu.iota {dimensions = array<i32: 1>} : vector<1x128xi32>
    %c96_i32 = arith.constant 96 : i32
    %124 = vector.broadcast %c96_i32 : i32 to vector<1x128xi32>
    %125 = arith.cmpi slt, %123, %124 : vector<1x128xi32>
    %cst_66 = arith.constant 5.000000e-01 : f32
    %cst_67 = arith.constant 1.000000e+00 : f32
    %126 = vector.broadcast %cst_66 : f32 to vector<1x128xf32>
    %127 = vector.broadcast %cst_67 : f32 to vector<1x128xf32>
    %128 = arith.select %125, %126, %127 : vector<1x128xi1>, vector<1x128xf32>
    %c96_i32_68 = arith.constant 96 : i32
    %129 = vector.broadcast %c96_i32_68 : i32 to vector<1x128xi32>
    %130 = arith.cmpi slt, %123, %129 : vector<1x128xi32>
    %cst_69 = arith.constant 5.000000e-01 : f32
    %cst_70 = arith.constant 0.000000e+00 : f32
    %131 = vector.broadcast %cst_69 : f32 to vector<1x128xf32>
    %132 = vector.broadcast %cst_70 : f32 to vector<1x128xf32>
    %133 = arith.select %130, %131, %132 : vector<1x128xi1>, vector<1x128xf32>
    %cst_71 = arith.constant 0.000000e+00 : f32
    %134 = vector.broadcast %cst_71 : f32 to vector<2x32xf32>
    %cst_72 = arith.constant 0.000000e+00 : f32
    %135 = vector.broadcast %cst_72 : f32 to vector<2x32xf32>
    %136 = vector.extract_strided_slice %120 {offsets = [0, 0], sizes = [2, 128], strides = [1, 1]} : vector<16x128xf32> to vector<2x128xf32>
    %cst_73 = arith.constant dense<0.000000e+00> : vector<2x128xf32>
    %137 = tpu.matmul %134, %121, %cst_73 {dimension_numbers = #tpu.dot_dimension_numbers<[1], [0], [0], [1], [0, 0, 1, 1], [], []>} : vector<2x32xf32>, vector<32x128xf32>, vector<2x128xf32> -> vector<2x128xf32>
    %138 = arith.addf %136, %137 : vector<2x128xf32>
    %139 = math.tanh %138 : vector<2x128xf32>
    %140 = vector.broadcast %128 : vector<1x128xf32> to vector<2x128xf32>
    %141 = arith.mulf %139, %140 : vector<2x128xf32>
    %142 = vector.broadcast %133 : vector<1x128xf32> to vector<2x128xf32>
    %143 = arith.addf %141, %142 : vector<2x128xf32>
    %144 = vector.extract_strided_slice %143 {offsets = [0, 0], sizes = [2, 32], strides = [1, 1]} : vector<2x128xf32> to vector<2x32xf32>
    %145 = vector.extract_strided_slice %143 {offsets = [0, 32], sizes = [2, 32], strides = [1, 1]} : vector<2x128xf32> to vector<2x32xf32>
    %146 = vector.extract_strided_slice %143 {offsets = [0, 64], sizes = [2, 32], strides = [1, 1]} : vector<2x128xf32> to vector<2x32xf32>
    %147 = vector.extract_strided_slice %143 {offsets = [0, 96], sizes = [2, 32], strides = [1, 1]} : vector<2x128xf32> to vector<2x32xf32>
    %148 = arith.mulf %145, %135 : vector<2x32xf32>
    %149 = arith.mulf %144, %147 : vector<2x32xf32>
    %150 = arith.addf %148, %149 : vector<2x32xf32>
    %151 = math.tanh %150 : vector<2x32xf32>
    %152 = arith.mulf %146, %151 : vector<2x32xf32>
    %153 = vector.extract_strided_slice %120 {offsets = [2, 0], sizes = [2, 128], strides = [1, 1]} : vector<16x128xf32> to vector<2x128xf32>
    %cst_74 = arith.constant dense<0.000000e+00> : vector<2x128xf32>
    %154 = tpu.matmul %152, %121, %cst_74 {dimension_numbers = #tpu.dot_dimension_numbers<[1], [0], [0], [1], [0, 0, 1, 1], [], []>} : vector<2x32xf32>, vector<32x128xf32>, vector<2x128xf32> -> vector<2x128xf32>
    %155 = arith.addf %153, %154 : vector<2x128xf32>
    %156 = math.tanh %155 : vector<2x128xf32>
    %157 = vector.broadcast %128 : vector<1x128xf32> to vector<2x128xf32>
    %158 = arith.mulf %156, %157 : vector<2x128xf32>
    %159 = vector.broadcast %133 : vector<1x128xf32> to vector<2x128xf32>
    %160 = arith.addf %158, %159 : vector<2x128xf32>
    %161 = vector.extract_strided_slice %160 {offsets = [0, 0], sizes = [2, 32], strides = [1, 1]} : vector<2x128xf32> to vector<2x32xf32>
    %162 = vector.extract_strided_slice %160 {offsets = [0, 32], sizes = [2, 32], strides = [1, 1]} : vector<2x128xf32> to vector<2x32xf32>
    %163 = vector.extract_strided_slice %160 {offsets = [0, 64], sizes = [2, 32], strides = [1, 1]} : vector<2x128xf32> to vector<2x32xf32>
    %164 = vector.extract_strided_slice %160 {offsets = [0, 96], sizes = [2, 32], strides = [1, 1]} : vector<2x128xf32> to vector<2x32xf32>
    %165 = arith.mulf %162, %150 : vector<2x32xf32>
    %166 = arith.mulf %161, %164 : vector<2x32xf32>
    %167 = arith.addf %165, %166 : vector<2x32xf32>
    %168 = math.tanh %167 : vector<2x32xf32>
    %169 = arith.mulf %163, %168 : vector<2x32xf32>
    %170 = vector.extract_strided_slice %120 {offsets = [4, 0], sizes = [2, 128], strides = [1, 1]} : vector<16x128xf32> to vector<2x128xf32>
    %cst_75 = arith.constant dense<0.000000e+00> : vector<2x128xf32>
    %171 = tpu.matmul %169, %121, %cst_75 {dimension_numbers = #tpu.dot_dimension_numbers<[1], [0], [0], [1], [0, 0, 1, 1], [], []>} : vector<2x32xf32>, vector<32x128xf32>, vector<2x128xf32> -> vector<2x128xf32>
    %172 = arith.addf %170, %171 : vector<2x128xf32>
    %173 = math.tanh %172 : vector<2x128xf32>
    %174 = vector.broadcast %128 : vector<1x128xf32> to vector<2x128xf32>
    %175 = arith.mulf %173, %174 : vector<2x128xf32>
    %176 = vector.broadcast %133 : vector<1x128xf32> to vector<2x128xf32>
    %177 = arith.addf %175, %176 : vector<2x128xf32>
    %178 = vector.extract_strided_slice %177 {offsets = [0, 0], sizes = [2, 32], strides = [1, 1]} : vector<2x128xf32> to vector<2x32xf32>
    %179 = vector.extract_strided_slice %177 {offsets = [0, 32], sizes = [2, 32], strides = [1, 1]} : vector<2x128xf32> to vector<2x32xf32>
    %180 = vector.extract_strided_slice %177 {offsets = [0, 64], sizes = [2, 32], strides = [1, 1]} : vector<2x128xf32> to vector<2x32xf32>
    %181 = vector.extract_strided_slice %177 {offsets = [0, 96], sizes = [2, 32], strides = [1, 1]} : vector<2x128xf32> to vector<2x32xf32>
    %182 = arith.mulf %179, %167 : vector<2x32xf32>
    %183 = arith.mulf %178, %181 : vector<2x32xf32>
    %184 = arith.addf %182, %183 : vector<2x32xf32>
    %185 = math.tanh %184 : vector<2x32xf32>
    %186 = arith.mulf %180, %185 : vector<2x32xf32>
    %187 = vector.extract_strided_slice %120 {offsets = [6, 0], sizes = [2, 128], strides = [1, 1]} : vector<16x128xf32> to vector<2x128xf32>
    %cst_76 = arith.constant dense<0.000000e+00> : vector<2x128xf32>
    %188 = tpu.matmul %186, %121, %cst_76 {dimension_numbers = #tpu.dot_dimension_numbers<[1], [0], [0], [1], [0, 0, 1, 1], [], []>} : vector<2x32xf32>, vector<32x128xf32>, vector<2x128xf32> -> vector<2x128xf32>
    %189 = arith.addf %187, %188 : vector<2x128xf32>
    %190 = math.tanh %189 : vector<2x128xf32>
    %191 = vector.broadcast %128 : vector<1x128xf32> to vector<2x128xf32>
    %192 = arith.mulf %190, %191 : vector<2x128xf32>
    %193 = vector.broadcast %133 : vector<1x128xf32> to vector<2x128xf32>
    %194 = arith.addf %192, %193 : vector<2x128xf32>
    %195 = vector.extract_strided_slice %194 {offsets = [0, 0], sizes = [2, 32], strides = [1, 1]} : vector<2x128xf32> to vector<2x32xf32>
    %196 = vector.extract_strided_slice %194 {offsets = [0, 32], sizes = [2, 32], strides = [1, 1]} : vector<2x128xf32> to vector<2x32xf32>
    %197 = vector.extract_strided_slice %194 {offsets = [0, 64], sizes = [2, 32], strides = [1, 1]} : vector<2x128xf32> to vector<2x32xf32>
    %198 = vector.extract_strided_slice %194 {offsets = [0, 96], sizes = [2, 32], strides = [1, 1]} : vector<2x128xf32> to vector<2x32xf32>
    %199 = arith.mulf %196, %184 : vector<2x32xf32>
    %200 = arith.mulf %195, %198 : vector<2x32xf32>
    %201 = arith.addf %199, %200 : vector<2x32xf32>
    %202 = math.tanh %201 : vector<2x32xf32>
    %203 = arith.mulf %197, %202 : vector<2x32xf32>
    %204 = vector.extract_strided_slice %120 {offsets = [8, 0], sizes = [2, 128], strides = [1, 1]} : vector<16x128xf32> to vector<2x128xf32>
    %cst_77 = arith.constant dense<0.000000e+00> : vector<2x128xf32>
    %205 = tpu.matmul %203, %121, %cst_77 {dimension_numbers = #tpu.dot_dimension_numbers<[1], [0], [0], [1], [0, 0, 1, 1], [], []>} : vector<2x32xf32>, vector<32x128xf32>, vector<2x128xf32> -> vector<2x128xf32>
    %206 = arith.addf %204, %205 : vector<2x128xf32>
    %207 = math.tanh %206 : vector<2x128xf32>
    %208 = vector.broadcast %128 : vector<1x128xf32> to vector<2x128xf32>
    %209 = arith.mulf %207, %208 : vector<2x128xf32>
    %210 = vector.broadcast %133 : vector<1x128xf32> to vector<2x128xf32>
    %211 = arith.addf %209, %210 : vector<2x128xf32>
    %212 = vector.extract_strided_slice %211 {offsets = [0, 0], sizes = [2, 32], strides = [1, 1]} : vector<2x128xf32> to vector<2x32xf32>
    %213 = vector.extract_strided_slice %211 {offsets = [0, 32], sizes = [2, 32], strides = [1, 1]} : vector<2x128xf32> to vector<2x32xf32>
    %214 = vector.extract_strided_slice %211 {offsets = [0, 64], sizes = [2, 32], strides = [1, 1]} : vector<2x128xf32> to vector<2x32xf32>
    %215 = vector.extract_strided_slice %211 {offsets = [0, 96], sizes = [2, 32], strides = [1, 1]} : vector<2x128xf32> to vector<2x32xf32>
    %216 = arith.mulf %213, %201 : vector<2x32xf32>
    %217 = arith.mulf %212, %215 : vector<2x32xf32>
    %218 = arith.addf %216, %217 : vector<2x32xf32>
    %219 = math.tanh %218 : vector<2x32xf32>
    %220 = arith.mulf %214, %219 : vector<2x32xf32>
    %221 = vector.extract_strided_slice %120 {offsets = [10, 0], sizes = [2, 128], strides = [1, 1]} : vector<16x128xf32> to vector<2x128xf32>
    %cst_78 = arith.constant dense<0.000000e+00> : vector<2x128xf32>
    %222 = tpu.matmul %220, %121, %cst_78 {dimension_numbers = #tpu.dot_dimension_numbers<[1], [0], [0], [1], [0, 0, 1, 1], [], []>} : vector<2x32xf32>, vector<32x128xf32>, vector<2x128xf32> -> vector<2x128xf32>
    %223 = arith.addf %221, %222 : vector<2x128xf32>
    %224 = math.tanh %223 : vector<2x128xf32>
    %225 = vector.broadcast %128 : vector<1x128xf32> to vector<2x128xf32>
    %226 = arith.mulf %224, %225 : vector<2x128xf32>
    %227 = vector.broadcast %133 : vector<1x128xf32> to vector<2x128xf32>
    %228 = arith.addf %226, %227 : vector<2x128xf32>
    %229 = vector.extract_strided_slice %228 {offsets = [0, 0], sizes = [2, 32], strides = [1, 1]} : vector<2x128xf32> to vector<2x32xf32>
    %230 = vector.extract_strided_slice %228 {offsets = [0, 32], sizes = [2, 32], strides = [1, 1]} : vector<2x128xf32> to vector<2x32xf32>
    %231 = vector.extract_strided_slice %228 {offsets = [0, 64], sizes = [2, 32], strides = [1, 1]} : vector<2x128xf32> to vector<2x32xf32>
    %232 = vector.extract_strided_slice %228 {offsets = [0, 96], sizes = [2, 32], strides = [1, 1]} : vector<2x128xf32> to vector<2x32xf32>
    %233 = arith.mulf %230, %218 : vector<2x32xf32>
    %234 = arith.mulf %229, %232 : vector<2x32xf32>
    %235 = arith.addf %233, %234 : vector<2x32xf32>
    %236 = math.tanh %235 : vector<2x32xf32>
    %237 = arith.mulf %231, %236 : vector<2x32xf32>
    %238 = vector.extract_strided_slice %120 {offsets = [12, 0], sizes = [2, 128], strides = [1, 1]} : vector<16x128xf32> to vector<2x128xf32>
    %cst_79 = arith.constant dense<0.000000e+00> : vector<2x128xf32>
    %239 = tpu.matmul %237, %121, %cst_79 {dimension_numbers = #tpu.dot_dimension_numbers<[1], [0], [0], [1], [0, 0, 1, 1], [], []>} : vector<2x32xf32>, vector<32x128xf32>, vector<2x128xf32> -> vector<2x128xf32>
    %240 = arith.addf %238, %239 : vector<2x128xf32>
    %241 = math.tanh %240 : vector<2x128xf32>
    %242 = vector.broadcast %128 : vector<1x128xf32> to vector<2x128xf32>
    %243 = arith.mulf %241, %242 : vector<2x128xf32>
    %244 = vector.broadcast %133 : vector<1x128xf32> to vector<2x128xf32>
    %245 = arith.addf %243, %244 : vector<2x128xf32>
    %246 = vector.extract_strided_slice %245 {offsets = [0, 0], sizes = [2, 32], strides = [1, 1]} : vector<2x128xf32> to vector<2x32xf32>
    %247 = vector.extract_strided_slice %245 {offsets = [0, 32], sizes = [2, 32], strides = [1, 1]} : vector<2x128xf32> to vector<2x32xf32>
    %248 = vector.extract_strided_slice %245 {offsets = [0, 64], sizes = [2, 32], strides = [1, 1]} : vector<2x128xf32> to vector<2x32xf32>
    %249 = vector.extract_strided_slice %245 {offsets = [0, 96], sizes = [2, 32], strides = [1, 1]} : vector<2x128xf32> to vector<2x32xf32>
    %250 = arith.mulf %247, %235 : vector<2x32xf32>
    %251 = arith.mulf %246, %249 : vector<2x32xf32>
    %252 = arith.addf %250, %251 : vector<2x32xf32>
    %253 = math.tanh %252 : vector<2x32xf32>
    %254 = arith.mulf %248, %253 : vector<2x32xf32>
    %255 = vector.extract_strided_slice %120 {offsets = [14, 0], sizes = [2, 128], strides = [1, 1]} : vector<16x128xf32> to vector<2x128xf32>
    %cst_80 = arith.constant dense<0.000000e+00> : vector<2x128xf32>
    %256 = tpu.matmul %254, %121, %cst_80 {dimension_numbers = #tpu.dot_dimension_numbers<[1], [0], [0], [1], [0, 0, 1, 1], [], []>} : vector<2x32xf32>, vector<32x128xf32>, vector<2x128xf32> -> vector<2x128xf32>
    %257 = arith.addf %255, %256 : vector<2x128xf32>
    %258 = math.tanh %257 : vector<2x128xf32>
    %259 = vector.broadcast %128 : vector<1x128xf32> to vector<2x128xf32>
    %260 = arith.mulf %258, %259 : vector<2x128xf32>
    %261 = vector.broadcast %133 : vector<1x128xf32> to vector<2x128xf32>
    %262 = arith.addf %260, %261 : vector<2x128xf32>
    %263 = vector.extract_strided_slice %262 {offsets = [0, 0], sizes = [2, 32], strides = [1, 1]} : vector<2x128xf32> to vector<2x32xf32>
    %264 = vector.extract_strided_slice %262 {offsets = [0, 32], sizes = [2, 32], strides = [1, 1]} : vector<2x128xf32> to vector<2x32xf32>
    %265 = vector.extract_strided_slice %262 {offsets = [0, 64], sizes = [2, 32], strides = [1, 1]} : vector<2x128xf32> to vector<2x32xf32>
    %266 = vector.extract_strided_slice %262 {offsets = [0, 96], sizes = [2, 32], strides = [1, 1]} : vector<2x128xf32> to vector<2x32xf32>
    %267 = arith.mulf %264, %252 : vector<2x32xf32>
    %268 = arith.mulf %263, %266 : vector<2x32xf32>
    %269 = arith.addf %267, %268 : vector<2x32xf32>
    %270 = math.tanh %269 : vector<2x32xf32>
    %271 = arith.mulf %265, %270 : vector<2x32xf32>
    %cst_81 = arith.constant dense<0.000000e+00> : vector<2x32xf32>
    %272 = tpu.matmul %271, %122, %cst_81 {dimension_numbers = #tpu.dot_dimension_numbers<[1], [0], [0], [1], [0, 0, 1, 1], [], []>} : vector<2x32xf32>, vector<32x32xf32>, vector<2x32xf32> -> vector<2x32xf32>
    %273 = vector.broadcast %3 : vector<1x32xf32> to vector<2x32xf32>
    %274 = arith.addf %272, %273 : vector<2x32xf32>
    %275 = math.tanh %274 : vector<2x32xf32>
    %c0_82 = arith.constant 0 : index
    %c0_83 = arith.constant 0 : index
    %276 = vector.load %arg7[%c0_82, %c0_83] : memref<2x32xf32, #tpu.memory_space<vmem>>, vector<2x32xf32>
    tpu.vector_store %arg7[%c0_82, %c0_83], %275 {strides = array<i32>} : memref<2x32xf32, #tpu.memory_space<vmem>>, vector<2x32xf32>,
    return
  }
  func.func @transform_0(%arg0: i32) -> (i32, i32) {
    %c0_i32 = arith.constant 0 : i32
    %c0_i32_0 = arith.constant 0 : i32
    %c0_i32_1 = arith.constant 0 : i32
    return %c0_i32, %c0_i32_0 : i32, i32
  }
  func.func @transform_1(%arg0: i32) -> (i32, i32) {
    %c0_i32 = arith.constant 0 : i32
    %c0_i32_0 = arith.constant 0 : i32
    %c0_i32_1 = arith.constant 0 : i32
    return %c0_i32, %c0_i32_0 : i32, i32
  }
  func.func @transform_2(%arg0: i32) -> (i32, i32) {
    %c0_i32 = arith.constant 0 : i32
    %c0_i32_0 = arith.constant 0 : i32
    %c0_i32_1 = arith.constant 0 : i32
    return %c0_i32, %c0_i32_0 : i32, i32
  }
  func.func @transform_3(%arg0: i32) -> (i32, i32, i32) {
    %c0_i32 = arith.constant 0 : i32
    %c0_i32_0 = arith.constant 0 : i32
    %c0_i32_1 = arith.constant 0 : i32
    %c0_i32_2 = arith.constant 0 : i32
    return %c0_i32, %c0_i32_0, %c0_i32_1 : i32, i32, i32
  }
  func.func @transform_4(%arg0: i32) -> (i32, i32, i32) {
    %c0_i32 = arith.constant 0 : i32
    %c0_i32_0 = arith.constant 0 : i32
    %c0_i32_1 = arith.constant 0 : i32
    %c0_i32_2 = arith.constant 0 : i32
    return %c0_i32, %c0_i32_0, %c0_i32_1 : i32, i32, i32
  }
  func.func @transform_5(%arg0: i32) -> (i32, i32) {
    %c0_i32 = arith.constant 0 : i32
    %c0_i32_0 = arith.constant 0 : i32
    %c0_i32_1 = arith.constant 0 : i32
    return %c0_i32, %c0_i32_0 : i32, i32
  }
  func.func @transform_6(%arg0: i32) -> (i32, i32) {
    %c0_i32 = arith.constant 0 : i32
    %c0_i32_0 = arith.constant 0 : i32
    %c0_i32_1 = arith.constant 0 : i32
    return %c0_i32, %c0_i32_0 : i32, i32
  }
}

</mosaic_0001>

<bundles_post_ra>
// kernel: tpu_custom_call.1
= control target key start
LH: loop header
LB: loop body
LE: loop exit
PB: predicated region body
PF: predicated region fallthrough
CT: control target
= control target key end

     0   :  { %11 = vsyncpa [#allocation3], 0  ;;  %s5096_s0 = inlined_call_operand.vmem [shape: f32[64,4], index: 0, kind: input, shape index: {}]   ;;  %s5097_s1 = inlined_call_operand.vmem [shape: f32[4,64], index: 1, kind: input, shape index: {}]   ;;  %s5098_s2 = inlined_call_operand.vmem [shape: f32[8,128], index: 2, kind: input, shape index: {}]   ;;  %s5099_s3 = inlined_call_operand.hbm [shape: f32[12,64,64], index: 3, kind: input, shape index: {}]   ;;  %s5100_s4 = inlined_call_operand.hbm [shape: f32[4,64,128], index: 4, kind: input, shape index: {}]   ;;  %s5101_s5 = inlined_call_operand.vmem [shape: f32[64,128], index: 5, kind: input, shape index: {}]   ;;  %s5102_s6 = inlined_call_operand.hbm [shape: f32[2,32], index: 6, kind: output, shape index: {}]  }
   0x1   :  { %12 = vsyncpa [#allocation6], 0 }
   0x2   :  { %13 = vsyncpa [#allocation4], 0  ;;  %s4552_s21 = smov [#allocation2]   ;;  %s4480_s25 = scalar_lea.hbm %s5099_s3, 12288 }
   0x3   :  { %s25_s22 = sshll.u32 %s4552_s21, 4  ;;  %p4481_p0 = scmp.ne.s32.totalorder %s5099_s3, %s4480_s25  ;;  %s26_s22 = int_to_ptr.vmem [resolvable:$true] %s25_s22 }
   0x4   :  { %p4484_p1 = scmp.lt.u32.totalorder %s4480_s25, %s5099_s3 }
   0x6   :  { %p4486_p2 = pnand %p4484_p1, %p4481_p0 }
   0x8   :  { %4489 = shalt.err (!%p4486_p2)
}
   0x9   :  { %s4490_s30 = scalar_lea.vmem %s26_s22, 12288  ;;  %p4495_p4 = scmp.lt.s32.totalorder %s26_s22, %s26_s22 }
   0xa   :  { %p4491_p3 = scmp.ne.s32.totalorder %s26_s22, %s4490_s30  ;;  %p4496_p5 = scmp.lt.s32.totalorder %s4490_s30, %s4490_s30 }
   0xc   :  { %p4497_p6 = por %p4496_p5, %p4495_p4 }
   0xe   :  { %p4498_p7 = pnand %p4497_p6, %p4491_p3 }
  0x10   :  { %4501 = shalt.err (!%p4498_p7)
}
  0x11   :  { %s4553_s7 = smov 128   ;;  %s4554_s8 = smov 8  }
  0x12   :  { %31 = dma.hbm_to_vmem [thread:$0]  %s5099_s3, 12288, %s26_s22, [#allocation3], %s4553_s7, %s4553_s7, %s4554_s8  }
  0x13   :  { %s4555_s11 = smov [#allocation5]   ;;  %s4502_s15 = scalar_lea.hbm %s5100_s4, 4096 }
  0x14   :  { %s37_s12 = sshll.u32 %s4555_s11, 4  ;;  %p4503_p8 = scmp.ne.s32.totalorder %s5100_s4, %s4502_s15  ;;  %s38_s12 = int_to_ptr.vmem [resolvable:$true] %s37_s12 }
  0x15   :  { %p4506_p9 = scmp.lt.u32.totalorder %s4502_s15, %s5100_s4 }
  0x17   :  { %p4508_p10 = pnand %p4506_p9, %p4503_p8 }
  0x19   :  { %4511 = shalt.err (!%p4508_p10)
}
  0x1a   :  { %s4512_s20 = scalar_lea.vmem %s38_s12, 4096  ;;  %p4517_p12 = scmp.lt.s32.totalorder %s38_s12, %s38_s12 }
  0x1b   :  { %p4513_p11 = scmp.ne.s32.totalorder %s38_s12, %s4512_s20  ;;  %p4518_p13 = scmp.lt.s32.totalorder %s4512_s20, %s4512_s20 }
  0x1d   :  { %p4519_p0 = por %p4518_p13, %p4517_p12 }
  0x1f   :  { %p4520_p1 = pnand %p4519_p0, %p4513_p11 }
  0x21   :  { %4523 = shalt.err (!%p4520_p1)
}
  0x22   :  { %43 = dma.hbm_to_vmem [thread:$0]  %s5100_s4, 4096, %s38_s12, [#allocation6], %s4553_s7, %s4553_s7, %s4554_s8  }
  0x23   :  { %4546 = dma.done.wait [#allocation3], 12288  }
  0x24   :  { %4547 = vsyncadd [#allocation3], 4294955008 }
  0x25   :  { %4548 = dma.done.wait [#allocation6], 4096  }
  0x26   :  { %4549 = vsyncadd [#allocation6], 4294963200  ;;  %v62_v0 = vlaneseq  ;;  %vm91_vm0 = vcmask 1043456   ;;  %vm66_vm1 = vcmask 31744   ;;  %v61_v2 = vld [vmem:[%s5097_s1] sm:$0xf] }
  0x27   :  { %v53_v3 = vld [vmem:[%s5096_s0] sm:$0xff]  ;;  %v54_v4 = vld [vmem:[%s5096_s0 + $0x8] sm:$0xff]  ;;  %3527 = vmatprep.subr.msk.mxu0 %vm91_vm0, %v61_v2  ;;  %v55_v6 = vld [vmem:[%s5096_s0 + $0x10] sm:$0xff]  ;;  %s4556_s10 = smov 64   ;;  %vm249_vm2 = vcmask 523264   ;;  %vm4559_vm3 = vmmov 0  }
  0x28   :  { %v4623_v1 = vshrl.u32 %v62_v0, 7  ;;  %3529 = vmatprep.mubr.msk.f32.mxu0 %vm66_vm1, %v53_v3  ;;  %3528 = vmatpush3.msk.msra.mxu0 %vm91_vm0, %v61_v2  ;;  %v4643_v7 = vld [vmem:[%s5098_s2] sm:$0xff]  ;;  %v242_v9 = vld [vmem:[#allocation2 + $0x48] sm:$0xff]  ;;  %v56_v10 = vld [vmem:[%s5096_s0 + $0x18] sm:$0xff]  ;;  %vm2227_vm5 = vcmask 261120   ;;  %vm3118_vm6 = vcmask 254976  }
  0x29   :  { %3530 = vmatmul.mubr.msk.f32.vlgmr.msra.gmra.mrb[0].mxu0 %vm66_vm1, %v54_v4  ;;  %v241_v8 = vld [vmem:[#allocation2 + $0x40] sm:$0xff]  ;;  %v243_v13 = vld [vmem:[#allocation2 + $0x50] sm:$0xff]  ;;  %v244_v14 = vld [vmem:[#allocation2 + $0x58] sm:$0xff] }
  0x2a   :  { %v202_v5 = vsub.s32 1, %v4623_v1  ;;  %3532 = vmatprep.mubr.msk.f32.mxu0 %vm66_vm1, %v55_v6  ;;  %v4052_v12 = vpack.c.bf16 %v242_v9, %v241_v8  ;;  %v57_v15 = vld [vmem:[%s5096_s0 + $0x20] sm:$0xff]  ;;  %v4056_v16 = vpack.c.bf16 %v244_v14, %v243_v13  ;;  %v58_v17 = vld [vmem:[%s5096_s0 + $0x28] sm:$0xff]  ;;  %v59_v18 = vld [vmem:[%s5096_s0 + $0x30] sm:$0xff]  ;;  %v611_v29 = vsub.s32 2, %v4623_v1 }
  0x2b   :  { %v60_v19 = vld [vmem:[%s5096_s0 + $0x38] sm:$0xff]  ;;  %v245_v20 = vld [vmem:[#allocation2 + $0x60] sm:$0xff]  ;;  %v246_v21 = vld [vmem:[#allocation2 + $0x68] sm:$0xff]  ;;  %v64_v37 = vsub.s32 0, %v4623_v1 }
  0x2c   :  { %v4650_v11 = vrot.slane %v4643_v7, %v202_v5  ;;  %4053 = vmatprep.subr.bf16.mxu1 %v4052_v12  ;;  %v4060_v22 = vpack.c.bf16 %v246_v21, %v245_v20  ;;  %v247_v23 = vld [vmem:[#allocation2 + $0x70] sm:$0xff]  ;;  %v248_v24 = vld [vmem:[#allocation2 + $0x78] sm:$0xff]  ;;  %v232_v26 = vld [vmem:[#allocation2] sm:$0xff]  ;;  %v4673_v35 = vrot.slane %v4643_v7, %v611_v29 }
  0x2d   :  { %3533 = vmatmul.mubr.msk.f32.gmra.mrb[2].mxu0 %vm66_vm1, %v56_v10  ;;  %4055 = vmatpush3.bf16.msra.mxu1 %v4052_v12  ;;  %v4064_v25 = vpack.c.bf16 %v248_v24, %v247_v23  ;;  %v233_v27 = vld [vmem:[#allocation2 + $0x8] sm:$0xff]  ;;  %v651_v30 = vld [vmem:[#allocation2 + $0x100] sm:$0xff]  ;;  %v653_v32 = vld [vmem:[#allocation2 + $0x110] sm:$0xff]  ;;  %v65_v38 = vrot.slane %v4643_v7, %v64_v37 }
  0x2e   :  { %213 = vrot.lane.b32.xlu0 %v4650_v11, %s4556_s10  ;;  %3535 = vmatprep.mubr.msk.f32.mxu0 %vm66_vm1, %v57_v15  ;;  %v4068_v28 = vpack.c.bf16 %v233_v27, %v232_v26  ;;  %v652_v31 = vld [vmem:[#allocation2 + $0x108] sm:$0xff]  ;;  %v654_v34 = vld [vmem:[#allocation2 + $0x118] sm:$0xff]  ;;  %v234_v52 = vld [vmem:[#allocation2 + $0x10] sm:$0xff] }
  0x2f   :  { %4057 = vmatprep.subr.bf16.mxu1 %v4056_v16  ;;  %v4100_v33 = vpack.c.bf16 %v652_v31, %v651_v30  ;;  %v4104_v36 = vpack.c.bf16 %v654_v34, %v653_v32  ;;  %v235_v53 = vld [vmem:[#allocation2 + $0x18] sm:$0xff]  ;;  %v236_v3 = vld [vmem:[#allocation2 + $0x20] sm:$0xff]  ;;  %v237_v4 = vld [vmem:[#allocation2 + $0x28] sm:$0xff] }
  0x30   :  { %v4072_v61 = vpack.c.bf16 %v235_v53, %v234_v52  ;;  %v4076_v15 = vpack.c.bf16 %v237_v4, %v236_v3  ;;  %v488_v27 = vld [vmem:[#allocation2 + $0x80] sm:$0xff]  ;;  %v491_v32 = vld [vmem:[#allocation2 + $0x98] sm:$0xff]  ;;  %v493_v37 = vld [vmem:[#allocation2 + $0xa8] sm:$0xff] }
  0x31   :  { %3536 = vmatmul.mubr.msk.f32.gmra.mrb[4].mxu0 %vm66_vm1, %v58_v17  ;;  %4059 = vmatpush3.bf16.msra.mxu1 %v4056_v16  ;;  %v642_v52 = vld [vmem:[#allocation2 + $0xc0] sm:$0xff]  ;;  %v643_v53 = vld [vmem:[#allocation2 + $0xc8] sm:$0xff] }
  0x32   :  { %3538 = vmatprep.mubr.msk.f32.mxu0 %vm66_vm1, %v59_v18  ;;  %4061 = vmatprep.subr.bf16.mxu1 %v4060_v22  ;;  %v238_v18 = vld [vmem:[#allocation2 + $0x30] sm:$0xff] }
  0x33   :  { %4101 = vmatprep.subr.bf16.mxu0 %v4100_v33  ;;  %622 = vrot.lane.b32.xlu0 %v4673_v35, %s4556_s10 }
  0x34   :  { %4103 = vmatpush3.bf16.msra.mxu0 %v4100_v33  ;;  %v4557_v33 = vmov 0.0  }
  0x35   :  { %3539 = vmatmul.mubr.msk.f32.gmra.mrb[6].mxu0 %vm66_vm1, %v60_v19  ;;  %4063 = vmatpush3.bf16.msra.mxu1 %v4060_v22  ;;  %v239_v19 = vld [vmem:[#allocation2 + $0x38] sm:$0xff] }
  0x36   :  { %4065 = vmatprep.subr.bf16.mxu1 %v4064_v25  ;;  %4105 = vmatprep.subr.bf16.mxu0 %v4104_v36 }
  0x38   :  { %4107 = vmatpush3.bf16.msra.mxu0 %v4104_v36  ;;  %v492_v36 = vld [vmem:[#allocation2 + $0xa0] sm:$0xff] }
  0x39   :  { %4067 = vmatpush3.bf16.msra.mxu1 %v4064_v25  ;;  %v4080_v25 = vpack.c.bf16 %v239_v19, %v238_v18 }
  0x3a   :  { %4069 = vmatprep.subr.bf16.mxu1 %v4068_v28 }
  0xa0   :  { %v214_v43 = vpop.permute.xlu0 %213 }
  0xa5   :  { %v623_v4 = vpop.permute.xlu0 %622 }
  0xfc   :  { %v3531_v39 = vpop.f32.mrb[0].mxu0 }
  0xfd   :  { %v4679_v40 = vadd.f32 %v3531_v39, %v65_v38  ;;  %v161_v41 = vpop.f32.mrb[1].mxu0  ;;  %v494_v39 = vld [vmem:[#allocation2 + $0xb0] sm:$0xff] }
  0xfe   :  { %v4681_v42 = vadd.f32 %v161_v41, %v65_v38  ;;  %v495_v41 = vld [vmem:[#allocation2 + $0xb8] sm:$0xff] }
  0xff   :  { %v205_v44 = vmul.f32 %v4650_v11, %v4679_v40 }
 0x100   :  { %v204_v45 = vmul.f32 %v4650_v11, %v4681_v42  ;;  %v3534_v46 = vpop.f32.mrb[2].mxu0 }
 0x101   :  { %v4687_v47 = vadd.f32 %v3534_v46, %v65_v38  ;;  %v171_v48 = vpop.f32.mrb[3].mxu0  ;;  %v4689_v49 = vadd.f32 %v214_v43, %v205_v44  ;;  %v655_v44 = vld [vmem:[#allocation2 + $0x120] sm:$0xff] }
 0x102   :  { %v4691_v50 = vadd.f32 %v171_v48, %v65_v38  ;;  %v4693_v51 = vadd.f32 %v214_v43, %v204_v45  ;;  %v656_v45 = vld [vmem:[#allocation2 + $0x128] sm:$0xff]  ;;  %v657_v48 = vld [vmem:[#allocation2 + $0x130] sm:$0xff] }
 0x103   :  { %v207_v54 = vmul.f32 %v4650_v11, %v4687_v47  ;;  %v225_v60 = vmax.f32 %v4689_v49, 0.0  ;;  %v4108_v46 = vpack.c.bf16 %v656_v45, %v655_v44  ;;  %v658_v49 = vld [vmem:[#allocation2 + $0x138] sm:$0xff] }
 0x104   :  { %v206_v55 = vmul.f32 %v4650_v11, %v4691_v50  ;;  %v3537_v56 = vpop.f32.mrb[4].mxu0  ;;  %v224_v57 = vmax.f32 %v4693_v51, 0.0  ;;  %v4112_v51 = vpack.c.bf16 %v658_v49, %v657_v48 }
 0x105   :  { %v4700_v58 = vadd.f32 %v3537_v56, %v65_v38  ;;  %v181_v59 = vpop.f32.mrb[5].mxu0  ;;  %v219_v62 = vadd.f32 %v214_v43, %v207_v54  ;;  %4109 = vmatprep.subr.bf16.mxu0 %v4108_v46  ;;  %v4116_v54 = vpack.c.bf16 %v643_v53, %v642_v52  ;;  %v1065_v56 = vld [vmem:[#allocation2 + $0x1c0] sm:$0xff]  ;;  %v895_v53 = vld [vmem:[#allocation2 + $0x148] sm:$0xff] }
 0x106   :  { %v218_v63 = vadd.f32 %v214_v43, %v206_v55  ;;  %v4703_v2 = vadd.f32 %v181_v59, %v65_v38  ;;  %3557 = vmatprep.mubr.msk.f32.mxu1 %vm249_vm2, %v224_v57  ;;  %4111 = vmatpush3.bf16.msra.mxu0 %v4108_v46  ;;  %v1025_v55 = vsub.s32 3, %v4623_v1  ;;  %v1067_v59 = vld [vmem:[#allocation2 + $0x1d0] sm:$0xff]  ;;  %v894_v52 = vld [vmem:[#allocation2 + $0x140] sm:$0xff] }
 0x107   :  { %v209_v5 = vmul.f32 %v4650_v11, %v4700_v58  ;;  %3558 = vmatmul.mubr.msk.f32.vlgmr.msra.gmra.mrb[0].mxu1 %vm249_vm2, %v225_v60  ;;  %v227_v14 = vmax.f32 %v219_v62, 0.0  ;;  %4113 = vmatprep.subr.bf16.mxu0 %v4112_v51 }
 0x108   :  { %v4709_v6 = vmax.f32 %v218_v63, 0.0  ;;  %v208_v8 = vmul.f32 %v4650_v11, %v4703_v2  ;;  %4071 = vmatpush3.bf16.msra.mxu1 %v4068_v28  ;;  %v3540_v9 = vpop.f32.mrb[6].mxu0  ;;  %v489_v28 = vld [vmem:[#allocation2 + $0x88] sm:$0xff]  ;;  %v4748_v62 = vrot.slane %v4643_v7, %v1025_v55 }
 0x109   :  { %v221_v10 = vadd.f32 %v214_v43, %v209_v5  ;;  %v4713_v12 = vadd.f32 %v3540_v9, %v65_v38  ;;  %v191_v13 = vpop.f32.mrb[7].mxu0  ;;  %4073 = vmatprep.subr.bf16.mxu1 %v4072_v61  ;;  %v4084_v31 = vpack.c.bf16 %v489_v28, %v488_v27  ;;  %v647_v27 = vld [vmem:[#allocation2 + $0xe8] sm:$0xff] }
 0x10a   :  { %v220_v16 = vadd.f32 %v214_v43, %v208_v8  ;;  %v4715_v17 = vadd.f32 %v191_v13, %v65_v38  ;;  %3560 = vmatprep.mubr.msk.f32.mxu1 %vm249_vm2, %v4709_v6  ;;  %v4092_v38 = vpack.c.bf16 %v493_v37, %v492_v36  ;;  %4115 = vmatpush3.bf16.msra.mxu0 %v4112_v51 }
 0x10b   :  { %v211_v20 = vmul.f32 %v4650_v11, %v4713_v12  ;;  %3561 = vmatmul.mubr.msk.f32.gmra.mrb[2].mxu1 %vm249_vm2, %v227_v14  ;;  %v229_v23 = vmax.f32 %v221_v10, 0.0  ;;  %4117 = vmatprep.subr.bf16.mxu0 %v4116_v54 }
 0x10c   :  { %v228_v21 = vmax.f32 %v220_v16, 0.0  ;;  %v210_v22 = vmul.f32 %v4650_v11, %v4715_v17  ;;  %4075 = vmatpush3.bf16.msra.mxu1 %v4072_v61  ;;  %v490_v11 = vld [vmem:[#allocation2 + $0x90] sm:$0xff]  ;;  %v1068_v61 = vld [vmem:[#allocation2 + $0x1d8] sm:$0xff]  ;;  %1036 = vrot.lane.b32.xlu1 %v4748_v62, %s4556_s10 }
 0x10d   :  { %v223_v24 = vadd.f32 %v214_v43, %v211_v20  ;;  %4077 = vmatprep.subr.bf16.mxu1 %v4076_v15  ;;  %v4088_v34 = vpack.c.bf16 %v491_v32, %v490_v11  ;;  %v4152_v63 = vpack.c.bf16 %v1068_v61, %v1067_v59  ;;  %v899_v61 = vld [vmem:[#allocation2 + $0x168] sm:$0xff] }
 0x10e   :  { %v222_v26 = vadd.f32 %v214_v43, %v210_v22  ;;  %3563 = vmatprep.mubr.msk.f32.mxu1 %vm249_vm2, %v228_v21  ;;  %v4096_v43 = vpack.c.bf16 %v495_v41, %v494_v39  ;;  %v649_v39 = vld [vmem:[#allocation2 + $0xf8] sm:$0xff] }
 0x10f   :  { %3564 = vmatmul.mubr.msk.f32.gmra.mrb[4].mxu1 %vm249_vm2, %v229_v23  ;;  %v231_v30 = vmax.f32 %v223_v24, 0.0 }
 0x110   :  { %v230_v29 = vmax.f32 %v222_v26, 0.0  ;;  %4079 = vmatpush3.bf16.msra.mxu1 %v4076_v15  ;;  %v645_v15 = vld [vmem:[#allocation2 + $0xd8] sm:$0xff]  ;;  %v646_v26 = vld [vmem:[#allocation2 + $0xe0] sm:$0xff] }
 0x111   :  { %4081 = vmatprep.subr.bf16.mxu1 %v4080_v25 }
 0x112   :  { %3566 = vmatprep.mubr.msk.f32.mxu1 %vm249_vm2, %v230_v29 }
 0x113   :  { %3567 = vmatmul.mubr.msk.f32.gmra.mrb[6].mxu1 %vm249_vm2, %v231_v30 }
 0x114   :  { %4083 = vmatpush3.bf16.msra.mxu1 %v4080_v25  ;;  %3585 = vmatprep.mubr.f32.mxu1 %v4557_v33 }
 0x115   :  { %4085 = vmatprep.subr.bf16.mxu1 %v4084_v31 }
 0x117   :  { %3586 = vmatmul.mubr.f32.vlgmr.msra.gmra.mrb[0].mxu1 %v4557_v33 }
 0x118   :  { %4087 = vmatpush3.bf16.msra.mxu1 %v4084_v31  ;;  %3588 = vmatprep.mubr.msk.f32.mxu1 %vm249_vm2, %v224_v57  ;;  %v1066_v57 = vld [vmem:[#allocation2 + $0x1c8] sm:$0xff] }
 0x119   :  { %4089 = vmatprep.subr.bf16.mxu1 %v4088_v34 }
 0x11b   :  { %3589 = vmatmul.mubr.msk.f32.gmra.mrb[2].mxu1 %vm249_vm2, %v225_v60  ;;  %v4148_v60 = vpack.c.bf16 %v1066_v57, %v1065_v56  ;;  %v4132_v56 = vpack.c.bf16 %v895_v53, %v894_v52  ;;  %v897_v57 = vld [vmem:[#allocation2 + $0x158] sm:$0xff]  ;;  %v1060_v53 = vld [vmem:[#allocation2 + $0x1a0] sm:$0xff] }
 0x11c   :  { %4091 = vmatpush3.bf16.msra.mxu1 %v4088_v34  ;;  %3591 = vmatprep.mubr.msk.f32.mxu1 %vm249_vm2, %v4709_v6  ;;  %v4124_v34 = vpack.c.bf16 %v647_v27, %v646_v26 }
 0x11d   :  { %4093 = vmatprep.subr.bf16.mxu1 %v4092_v38 }
 0x11f   :  { %3592 = vmatmul.mubr.msk.f32.gmra.mrb[4].mxu1 %vm249_vm2, %v227_v14 }
 0x120   :  { %4095 = vmatpush3.bf16.msra.mxu1 %v4092_v38  ;;  %3594 = vmatprep.mubr.msk.f32.mxu1 %vm249_vm2, %v228_v21  ;;  %v648_v38 = vld [vmem:[#allocation2 + $0xf0] sm:$0xff] }
 0x121   :  { %4097 = vmatprep.subr.bf16.mxu1 %v4096_v43  ;;  %v4128_v49 = vpack.c.bf16 %v649_v39, %v648_v38  ;;  %v1059_v39 = vld [vmem:[#allocation2 + $0x198] sm:$0xff] }
 0x123   :  { %3595 = vmatmul.mubr.msk.f32.gmra.mrb[6].mxu1 %vm249_vm2, %v229_v23 }
 0x124   :  { %4099 = vmatpush3.bf16.msra.mxu1 %v4096_v43  ;;  %3613 = vmatprep.mubr.msk.f32.mxu1 %vm249_vm2, %v4709_v6 }
 0x125   :  { %4149 = vmatprep.subr.bf16.mxu1 %v4148_v60 }
 0x127   :  { %3614 = vmatmul.mubr.msk.f32.vlgmr.msra.gmra.mrb[0].mxu1 %vm249_vm2, %v227_v14  ;;  %v644_v14 = vld [vmem:[#allocation2 + $0xd0] sm:$0xff] }
 0x128   :  { %3616 = vmatprep.mubr.msk.f32.mxu1 %vm249_vm2, %v228_v21  ;;  %4151 = vmatpush3.bf16.msra.mxu1 %v4148_v60  ;;  %v898_v60 = vld [vmem:[#allocation2 + $0x160] sm:$0xff] }
 0x129   :  { %4153 = vmatprep.subr.bf16.mxu1 %v4152_v63 }
 0x12b   :  { %3617 = vmatmul.mubr.msk.f32.gmra.mrb[2].mxu1 %vm249_vm2, %v229_v23  ;;  %v4120_v23 = vpack.c.bf16 %v645_v15, %v644_v14  ;;  %v1056_v15 = vld [vmem:[#allocation2 + $0x180] sm:$0xff] }
 0x12c   :  { %3619 = vmatprep.mubr.msk.f32.mxu1 %vm249_vm2, %v230_v29  ;;  %4155 = vmatpush3.bf16.msra.mxu1 %v4152_v63  ;;  %v4140_v63 = vpack.c.bf16 %v899_v61, %v898_v60 }
 0x12f   :  { %3620 = vmatmul.mubr.msk.f32.gmra.mrb[4].mxu1 %vm249_vm2, %v231_v30 }
 0x130   :  { %3622 = vmatprep.mubr.f32.mxu1 %v4557_v33 }
 0x133   :  { %3623 = vmatmul.mubr.f32.gmra.mrb[6].mxu1 %v4557_v33 }
 0x1fa   :  { %v3615_v3 = vpop.f32.mrb[0].mxu1 }
 0x1fb   :  { %v614_v5 = vmul.f32 %v3615_v3, %v4673_v35  ;;  %v562_v6 = vpop.f32.mrb[1].mxu1  ;;  %v900_v3 = vld [vmem:[#allocation2 + $0x170] sm:$0xff] }
 0x1fc   :  { %v613_v8 = vmul.f32 %v4673_v35, %v562_v6  ;;  %v1069_v6 = vld [vmem:[#allocation2 + $0x1e0] sm:$0xff] }
 0x1fd   :  { %v4754_v9 = vadd.f32 %v623_v4, %v614_v5 }
 0x1fe   :  { %v3618_v10 = vpop.f32.mrb[2].mxu1  ;;  %v4756_v13 = vadd.f32 %v623_v4, %v613_v8  ;;  %v1070_v8 = vld [vmem:[#allocation2 + $0x1e8] sm:$0xff] }
 0x1ff   :  { %v616_v16 = vmul.f32 %v3618_v10, %v4673_v35  ;;  %v572_v18 = vpop.f32.mrb[3].mxu1  ;;  %v634_v22 = vmax.f32 %v4754_v9, 0.0  ;;  %v4156_v9 = vpack.c.bf16 %v1070_v8, %v1069_v6  ;;  %v1071_v10 = vld [vmem:[#allocation2 + $0x1f0] sm:$0xff] }
 0x200   :  { %v615_v19 = vmul.f32 %v4673_v35, %v572_v18  ;;  %v633_v20 = vmax.f32 %v4756_v13, 0.0  ;;  %v1072_v13 = vld [vmem:[#allocation2 + $0x1f8] sm:$0xff] }
 0x201   :  { %v628_v21 = vadd.f32 %v623_v4, %v616_v16  ;;  %4157 = vmatprep.subr.bf16.mxu1 %v4156_v9  ;;  %v4160_v14 = vpack.c.bf16 %v1072_v13, %v1071_v10  ;;  %v1057_v16 = vld [vmem:[#allocation2 + $0x188] sm:$0xff] }
 0x202   :  { %v627_v24 = vadd.f32 %v623_v4, %v615_v19  ;;  %v3621_v25 = vpop.f32.mrb[4].mxu1  ;;  %3641 = vmatprep.mubr.msk.f32.mxu0 %vm249_vm2, %v633_v20  ;;  %4159 = vmatpush3.bf16.msra.mxu1 %v4156_v9  ;;  %v4164_v18 = vpack.c.bf16 %v1057_v16, %v1056_v15  ;;  %v1431_v19 = vsub.s32 4, %v4623_v1  ;;  %v1309_v15 = vld [vmem:[#allocation2 + $0x208] sm:$0xff] }
 0x203   :  { %v618_v28 = vmul.f32 %v3621_v25, %v4673_v35  ;;  %v582_v29 = vpop.f32.mrb[5].mxu1  ;;  %3642 = vmatmul.mubr.msk.f32.vlgmr.msra.gmra.mrb[8].mxu0 %vm249_vm2, %v634_v22  ;;  %v636_v11 = vmax.f32 %v628_v21, 0.0  ;;  %4161 = vmatprep.subr.bf16.mxu1 %v4160_v14  ;;  %v1472_v21 = vld [vmem:[#allocation2 + $0x288] sm:$0xff] }
 0x204   :  { %v635_v30 = vmax.f32 %v627_v24, 0.0  ;;  %v617_v31 = vmul.f32 %v4673_v35, %v582_v29  ;;  %4119 = vmatpush3.bf16.msra.mxu0 %v4116_v54  ;;  %v1474_v24 = vld [vmem:[#allocation2 + $0x298] sm:$0xff]  ;;  %v4792_v25 = vrot.slane %v4643_v7, %v1431_v19 }
 0x205   :  { %v630_v32 = vadd.f32 %v623_v4, %v618_v28  ;;  %4121 = vmatprep.subr.bf16.mxu0 %v4120_v23 }
 0x206   :  { %v629_v36 = vadd.f32 %v623_v4, %v617_v31  ;;  %v3624_v37 = vpop.f32.mrb[6].mxu1  ;;  %3644 = vmatprep.mubr.msk.f32.mxu0 %vm249_vm2, %v635_v30  ;;  %4163 = vmatpush3.bf16.msra.mxu1 %v4160_v14  ;;  %v1037_v31 = vpop.permute.xlu1 %1036  ;;  %v1308_v14 = vld [vmem:[#allocation2 + $0x200] sm:$0xff] }
 0x207   :  { %v620_v41 = vmul.f32 %v3624_v37, %v4673_v35  ;;  %v592_v43 = vpop.f32.mrb[7].mxu1  ;;  %3645 = vmatmul.mubr.msk.f32.gmra.mrb[10].mxu0 %vm249_vm2, %v636_v11  ;;  %v638_v46 = vmax.f32 %v630_v32, 0.0  ;;  %4165 = vmatprep.subr.bf16.mxu1 %v4164_v18  ;;  %v4180_v19 = vpack.c.bf16 %v1309_v15, %v1308_v14  ;;  %v1467_v14 = vld [vmem:[#allocation2 + $0x268] sm:$0xff] }
 0x208   :  { %v637_v44 = vmax.f32 %v629_v36, 0.0  ;;  %v619_v45 = vmul.f32 %v4673_v35, %v592_v43  ;;  %4123 = vmatpush3.bf16.msra.mxu0 %v4120_v23  ;;  %v896_v35 = vld [vmem:[#allocation2 + $0x150] sm:$0xff]  ;;  %1442 = vrot.lane.b32.xlu1 %v4792_v25, %s4556_s10 }
 0x209   :  { %v632_v48 = vadd.f32 %v623_v4, %v620_v41  ;;  %4125 = vmatprep.subr.bf16.mxu0 %v4124_v34  ;;  %v4136_v59 = vpack.c.bf16 %v897_v57, %v896_v35 }
 0x20a   :  { %v631_v51 = vadd.f32 %v623_v4, %v619_v45  ;;  %3647 = vmatprep.mubr.msk.f32.mxu0 %vm249_vm2, %v637_v44  ;;  %v901_v4 = vld [vmem:[#allocation2 + $0x178] sm:$0xff] }
 0x20b   :  { %3648 = vmatmul.mubr.msk.f32.gmra.mrb[12].mxu0 %vm249_vm2, %v638_v46  ;;  %v640_v55 = vmax.f32 %v632_v48, 0.0  ;;  %v4144_v5 = vpack.c.bf16 %v901_v4, %v900_v3  ;;  %v1062_v4 = vld [vmem:[#allocation2 + $0x1b0] sm:$0xff] }
 0x20c   :  { %v639_v54 = vmax.f32 %v631_v51, 0.0  ;;  %4127 = vmatpush3.bf16.msra.mxu0 %v4124_v34 }
 0x20d   :  { %4129 = vmatprep.subr.bf16.mxu0 %v4128_v49 }
 0x20e   :  { %3650 = vmatprep.mubr.msk.f32.mxu0 %vm249_vm2, %v639_v54 }
 0x20f   :  { %3651 = vmatmul.mubr.msk.f32.gmra.mrb[14].mxu0 %vm249_vm2, %v640_v55 }
 0x210   :  { %4131 = vmatpush3.bf16.msra.mxu0 %v4128_v49  ;;  %3669 = vmatprep.mubr.f32.mxu0 %v4557_v33 }
 0x211   :  { %4133 = vmatprep.subr.bf16.mxu0 %v4132_v56 }
 0x213   :  { %3670 = vmatmul.mubr.f32.vlgmr.msra.gmra.mrb[8].mxu0 %v4557_v33 }
 0x214   :  { %4135 = vmatpush3.bf16.msra.mxu0 %v4132_v56  ;;  %3672 = vmatprep.mubr.msk.f32.mxu0 %vm249_vm2, %v633_v20  ;;  %v1471_v20 = vld [vmem:[#allocation2 + $0x280] sm:$0xff] }
 0x215   :  { %4137 = vmatprep.subr.bf16.mxu0 %v4136_v59  ;;  %v4196_v23 = vpack.c.bf16 %v1472_v21, %v1471_v20  ;;  %v1311_v20 = vld [vmem:[#allocation2 + $0x218] sm:$0xff] }
 0x217   :  { %3673 = vmatmul.mubr.msk.f32.gmra.mrb[10].mxu0 %vm249_vm2, %v634_v22  ;;  %v1473_v22 = vld [vmem:[#allocation2 + $0x290] sm:$0xff] }
 0x218   :  { %4139 = vmatpush3.bf16.msra.mxu0 %v4136_v59  ;;  %3675 = vmatprep.mubr.msk.f32.mxu0 %vm249_vm2, %v635_v30  ;;  %v4200_v26 = vpack.c.bf16 %v1474_v24, %v1473_v22  ;;  %v1312_v22 = vld [vmem:[#allocation2 + $0x220] sm:$0xff] }
 0x219   :  { %4141 = vmatprep.subr.bf16.mxu0 %v4140_v63 }
 0x21b   :  { %3676 = vmatmul.mubr.msk.f32.gmra.mrb[12].mxu0 %vm249_vm2, %v636_v11 }
 0x21c   :  { %4143 = vmatpush3.bf16.msra.mxu0 %v4140_v63  ;;  %3678 = vmatprep.mubr.msk.f32.mxu0 %vm249_vm2, %v637_v44 }
 0x21d   :  { %4145 = vmatprep.subr.bf16.mxu0 %v4144_v5 }
 0x21f   :  { %3679 = vmatmul.mubr.msk.f32.gmra.mrb[14].mxu0 %vm249_vm2, %v638_v46 }
 0x220   :  { %4147 = vmatpush3.bf16.msra.mxu0 %v4144_v5  ;;  %3697 = vmatprep.mubr.msk.f32.mxu0 %vm249_vm2, %v635_v30  ;;  %v1063_v5 = vld [vmem:[#allocation2 + $0x1b8] sm:$0xff] }
 0x221   :  { %4197 = vmatprep.subr.bf16.mxu0 %v4196_v23  ;;  %v4176_v13 = vpack.c.bf16 %v1063_v5, %v1062_v4 }
 0x223   :  { %3698 = vmatmul.mubr.msk.f32.vlgmr.msra.gmra.mrb[8].mxu0 %vm249_vm2, %v636_v11 }
 0x224   :  { %3700 = vmatprep.mubr.msk.f32.mxu0 %vm249_vm2, %v637_v44  ;;  %4199 = vmatpush3.bf16.msra.mxu0 %v4196_v23  ;;  %v1313_v23 = vld [vmem:[#allocation2 + $0x228] sm:$0xff] }
 0x225   :  { %4201 = vmatprep.subr.bf16.mxu0 %v4200_v26  ;;  %v4188_v24 = vpack.c.bf16 %v1313_v23, %v1312_v22 }
 0x227   :  { %3701 = vmatmul.mubr.msk.f32.gmra.mrb[10].mxu0 %vm249_vm2, %v638_v46 }
 0x228   :  { %3703 = vmatprep.mubr.msk.f32.mxu0 %vm249_vm2, %v639_v54  ;;  %4203 = vmatpush3.bf16.msra.mxu0 %v4200_v26  ;;  %v1061_v54 = vld [vmem:[#allocation2 + $0x1a8] sm:$0xff]  ;;  %v1314_v26 = vld [vmem:[#allocation2 + $0x230] sm:$0xff] }
 0x229   :  { %v4172_v61 = vpack.c.bf16 %v1061_v54, %v1060_v53 }
 0x22b   :  { %3704 = vmatmul.mubr.msk.f32.gmra.mrb[12].mxu0 %vm249_vm2, %v640_v55 }
 0x22c   :  { %3706 = vmatprep.mubr.f32.mxu0 %v4557_v33 }
 0x22f   :  { %3707 = vmatmul.mubr.f32.gmra.mrb[14].mxu0 %v4557_v33 }
 0x27a   :  { %v1443_v54 = vpop.permute.xlu1 %1442 }
 0x2f6   :  { %v3699_v27 = vpop.f32.mrb[8].mxu0 }
 0x2f7   :  { %v4797_v28 = vadd.f32 %v3699_v27, %v4679_v40  ;;  %v968_v29 = vpop.f32.mrb[9].mxu0  ;;  %v1315_v27 = vld [vmem:[#allocation2 + $0x238] sm:$0xff] }
 0x2f8   :  { %v4800_v30 = vadd.f32 %v968_v29, %v4681_v42  ;;  %v1058_v42 = vld [vmem:[#allocation2 + $0x190] sm:$0xff]  ;;  %v4192_v29 = vpack.c.bf16 %v1315_v27, %v1314_v26  ;;  %v1469_v26 = vld [vmem:[#allocation2 + $0x278] sm:$0xff] }
 0x2f9   :  { %v1028_v7 = vmul.f32 %v4748_v62, %v4797_v28  ;;  %v4168_v49 = vpack.c.bf16 %v1059_v39, %v1058_v42  ;;  %v1463_v42 = vld [vmem:[#allocation2 + $0x248] sm:$0xff] }
 0x2fa   :  { %v1027_v11 = vmul.f32 %v4748_v62, %v4800_v30  ;;  %v3702_v32 = vpop.f32.mrb[10].mxu0 }
 0x2fb   :  { %v4807_v34 = vadd.f32 %v3702_v32, %v4687_v47  ;;  %v978_v36 = vpop.f32.mrb[11].mxu0  ;;  %v4809_v37 = vadd.f32 %v1037_v31, %v1028_v7  ;;  %v1476_v7 = vld [vmem:[#allocation2 + $0x2a8] sm:$0xff]  ;;  %v1477_v32 = vld [vmem:[#allocation2 + $0x2b0] sm:$0xff] }
 0x2fc   :  { %v4812_v40 = vadd.f32 %v978_v36, %v4691_v50  ;;  %v4814_v38 = vadd.f32 %v1037_v31, %v1027_v11  ;;  %v1478_v36 = vld [vmem:[#allocation2 + $0x2b8] sm:$0xff] }
 0x2fd   :  { %v1030_v41 = vmul.f32 %v4748_v62, %v4807_v34  ;;  %v1048_v50 = vmax.f32 %v4809_v37, 0.0  ;;  %v4208_v37 = vpack.c.bf16 %v1478_v36, %v1477_v32 }
 0x2fe   :  { %v1029_v43 = vmul.f32 %v4748_v62, %v4812_v40  ;;  %v3705_v44 = vpop.f32.mrb[12].mxu0  ;;  %v1047_v47 = vmax.f32 %v4814_v38, 0.0  ;;  %v1462_v38 = vld [vmem:[#allocation2 + $0x240] sm:$0xff] }
 0x2ff   :  { %v1042_v45 = vadd.f32 %v1037_v31, %v1030_v41  ;;  %v4822_v46 = vadd.f32 %v3705_v44, %v4700_v58  ;;  %v988_v48 = vpop.f32.mrb[13].mxu0  ;;  %v4212_v39 = vpack.c.bf16 %v1463_v42, %v1462_v38  ;;  %v1843_v41 = vld [vmem:[#allocation5] sm:$0xff]  ;;  %v1845_v44 = vld [vmem:[#allocation5 + $0x10] sm:$0xff]  ;;  %v1715_v42 = vld [vmem:[#allocation2 + $0x2c8] sm:$0xff] }
 0x300   :  { %v1041_v51 = vadd.f32 %v1037_v31, %v1029_v43  ;;  %v4826_v52 = vadd.f32 %v988_v48, %v4703_v2  ;;  %3725 = vmatprep.mubr.msk.f32.mxu1 %vm249_vm2, %v1047_v47  ;;  %v1844_v43 = vld [vmem:[#allocation5 + $0x8] sm:$0xff]  ;;  %v1714_v38 = vld [vmem:[#allocation2 + $0x2c0] sm:$0xff] }
 0x301   :  { %v1032_v55 = vmul.f32 %v4748_v62, %v4822_v46  ;;  %3726 = vmatmul.mubr.msk.f32.vlgmr.msra.gmra.mrb[8].mxu1 %vm249_vm2, %v1048_v50  ;;  %v1050_v57 = vmax.f32 %v1042_v45, 0.0  ;;  %v1846_v45 = vld [vmem:[#allocation5 + $0x18] sm:$0xff] }
 0x302   :  { %v1049_v56 = vmax.f32 %v1041_v51, 0.0  ;;  %v1031_v58 = vmul.f32 %v4748_v62, %v4826_v52  ;;  %4167 = vmatpush3.bf16.msra.mxu1 %v4164_v18  ;;  %v3708_v35 = vpop.f32.mrb[14].mxu0  ;;  %v4248_v48 = vpack.c.bf16 %v1846_v45, %v1845_v44  ;;  %v1717_v44 = vld [vmem:[#allocation2 + $0x2d8] sm:$0xff]  ;;  %v1718_v45 = vld [vmem:[#allocation2 + $0x2e0] sm:$0xff] }
 0x303   :  { %v1044_v59 = vadd.f32 %v1037_v31, %v1032_v55  ;;  %v4835_v2 = vadd.f32 %v3708_v35, %v4713_v12  ;;  %v998_v60 = vpop.f32.mrb[15].mxu0  ;;  %4169 = vmatprep.subr.bf16.mxu1 %v4168_v49 }
 0x304   :  { %v1043_v63 = vadd.f32 %v1037_v31, %v1031_v58  ;;  %v4838_v3 = vadd.f32 %v998_v60, %v4715_v17  ;;  %3728 = vmatprep.mubr.msk.f32.mxu1 %vm249_vm2, %v1049_v56  ;;  %v1464_v60 = vld [vmem:[#allocation2 + $0x250] sm:$0xff] }
 0x305   :  { %v1034_v6 = vmul.f32 %v4748_v62, %v4835_v2  ;;  %3729 = vmatmul.mubr.msk.f32.gmra.mrb[10].mxu1 %vm249_vm2, %v1050_v57  ;;  %v1052_v9 = vmax.f32 %v1044_v59, 0.0 }
 0x306   :  { %v1051_v8 = vmax.f32 %v1043_v63, 0.0  ;;  %v1033_v12 = vmul.f32 %v4748_v62, %v4838_v3  ;;  %4171 = vmatpush3.bf16.msra.mxu1 %v4168_v49  ;;  %v1310_v62 = vld [vmem:[#allocation2 + $0x210] sm:$0xff]  ;;  %v1848_v49 = vld [vmem:[#allocation5 + $0x28] sm:$0xff] }
 0x307   :  { %v1046_v10 = vadd.f32 %v1037_v31, %v1034_v6  ;;  %4173 = vmatprep.subr.bf16.mxu1 %v4172_v61  ;;  %v4184_v21 = vpack.c.bf16 %v1311_v20, %v1310_v62 }
 0x308   :  { %v1045_v17 = vadd.f32 %v1037_v31, %v1033_v12  ;;  %3731 = vmatprep.mubr.msk.f32.mxu1 %vm249_vm2, %v1051_v8  ;;  %v1475_v31 = vld [vmem:[#allocation2 + $0x2a0] sm:$0xff] }
 0x309   :  { %3732 = vmatmul.mubr.msk.f32.gmra.mrb[12].mxu1 %vm249_vm2, %v1052_v9  ;;  %v1054_v18 = vmax.f32 %v1046_v10, 0.0  ;;  %v4204_v11 = vpack.c.bf16 %v1476_v7, %v1475_v31 }
 0x30a   :  { %v1053_v16 = vmax.f32 %v1045_v17, 0.0  ;;  %4175 = vmatpush3.bf16.msra.mxu1 %v4172_v61  ;;  %v1465_v61 = vld [vmem:[#allocation2 + $0x258] sm:$0xff]  ;;  %v1466_v17 = vld [vmem:[#allocation2 + $0x260] sm:$0xff] }
 0x30b   :  { %4177 = vmatprep.subr.bf16.mxu1 %v4176_v13  ;;  %4205 = vmatprep.subr.bf16.mxu0 %v4204_v11 }
 0x30c   :  { %3734 = vmatprep.mubr.msk.f32.mxu1 %vm249_vm2, %v1053_v16  ;;  %4207 = vmatpush3.bf16.msra.mxu0 %v4204_v11 }
 0x30d   :  { %3735 = vmatmul.mubr.msk.f32.gmra.mrb[14].mxu1 %vm249_vm2, %v1054_v18  ;;  %4209 = vmatprep.subr.bf16.mxu0 %v4208_v37 }
 0x30e   :  { %4179 = vmatpush3.bf16.msra.mxu1 %v4176_v13  ;;  %3753 = vmatprep.mubr.f32.mxu1 %v4557_v33 }
 0x30f   :  { %4181 = vmatprep.subr.bf16.mxu1 %v4180_v19 }
 0x310   :  { %4211 = vmatpush3.bf16.msra.mxu0 %v4208_v37 }
 0x311   :  { %3754 = vmatmul.mubr.f32.vlgmr.msra.gmra.mrb[8].mxu1 %v4557_v33  ;;  %4213 = vmatprep.subr.bf16.mxu0 %v4212_v39 }
 0x312   :  { %4183 = vmatpush3.bf16.msra.mxu1 %v4180_v19  ;;  %3756 = vmatprep.mubr.msk.f32.mxu1 %vm249_vm2, %v1047_v47  ;;  %v4244_v47 = vpack.c.bf16 %v1844_v43, %v1843_v41  ;;  %v4228_v43 = vpack.c.bf16 %v1715_v42, %v1714_v38  ;;  %v2036_v38 = vld [vmem:[#allocation5 + $0xa8] sm:$0xff] }
 0x313   :  { %4185 = vmatprep.subr.bf16.mxu1 %v4184_v21 }
 0x315   :  { %3757 = vmatmul.mubr.msk.f32.gmra.mrb[10].mxu1 %vm249_vm2, %v1048_v50  ;;  %v1847_v50 = vld [vmem:[#allocation5 + $0x20] sm:$0xff] }
 0x316   :  { %4187 = vmatpush3.bf16.msra.mxu1 %v4184_v21  ;;  %3759 = vmatprep.mubr.msk.f32.mxu1 %vm249_vm2, %v1049_v56  ;;  %v4252_v51 = vpack.c.bf16 %v1848_v49, %v1847_v50  ;;  %v4220_v21 = vpack.c.bf16 %v1467_v14, %v1466_v17  ;;  %v1720_v49 = vld [vmem:[#allocation2 + $0x2f0] sm:$0xff] }
 0x317   :  { %4189 = vmatprep.subr.bf16.mxu1 %v4188_v24 }
 0x319   :  { %3760 = vmatmul.mubr.msk.f32.gmra.mrb[12].mxu1 %vm249_vm2, %v1050_v57 }
 0x31a   :  { %4191 = vmatpush3.bf16.msra.mxu1 %v4188_v24  ;;  %3762 = vmatprep.mubr.msk.f32.mxu1 %vm249_vm2, %v1051_v8  ;;  %v1468_v24 = vld [vmem:[#allocation2 + $0x270] sm:$0xff] }
 0x31b   :  { %4193 = vmatprep.subr.bf16.mxu1 %v4192_v29  ;;  %v4224_v36 = vpack.c.bf16 %v1469_v26, %v1468_v24  ;;  %v2031_v26 = vld [vmem:[#allocation5 + $0x80] sm:$0xff] }
 0x31d   :  { %3763 = vmatmul.mubr.msk.f32.gmra.mrb[14].mxu1 %vm249_vm2, %v1052_v9 }
 0x31e   :  { %4195 = vmatpush3.bf16.msra.mxu1 %v4192_v29  ;;  %3781 = vmatprep.mubr.msk.f32.mxu1 %vm249_vm2, %v1049_v56 }
 0x31f   :  { %4245 = vmatprep.subr.bf16.mxu1 %v4244_v47 }
 0x321   :  { %3782 = vmatmul.mubr.msk.f32.vlgmr.msra.gmra.mrb[8].mxu1 %vm249_vm2, %v1050_v57 }
 0x322   :  { %3784 = vmatprep.mubr.msk.f32.mxu1 %vm249_vm2, %v1051_v8  ;;  %4247 = vmatpush3.bf16.msra.mxu1 %v4244_v47 }
 0x323   :  { %4249 = vmatprep.subr.bf16.mxu1 %v4248_v48 }
 0x325   :  { %3785 = vmatmul.mubr.msk.f32.gmra.mrb[10].mxu1 %vm249_vm2, %v1052_v9  ;;  %v4216_v9 = vpack.c.bf16 %v1465_v61, %v1464_v60  ;;  %v2215_v60 = vld [vmem:[%s5101_s5 + $0x8] sm:$0xff]  ;;  %v4558_v61 = vmov 0.0|0.0  }
 0x326   :  { %3787 = vmatprep.mubr.msk.f32.mxu1 %vm249_vm2, %v1053_v16  ;;  %4251 = vmatpush3.bf16.msra.mxu1 %v4248_v48  ;;  %v1719_v48 = vld [vmem:[#allocation2 + $0x2e8] sm:$0xff] }
 0x327   :  { %4253 = vmatprep.subr.bf16.mxu1 %v4252_v51  ;;  %v4236_v50 = vpack.c.bf16 %v1719_v48, %v1718_v45 }
 0x329   :  { %3788 = vmatmul.mubr.msk.f32.gmra.mrb[12].mxu1 %vm249_vm2, %v1054_v18 }
 0x32a   :  { %3790 = vmatprep.mubr.f32.mxu1 %v4557_v33  ;;  %4255 = vmatpush3.bf16.msra.mxu1 %v4252_v51  ;;  %v1721_v51 = vld [vmem:[#allocation2 + $0x2f8] sm:$0xff] }
 0x32d   :  { %3791 = vmatmul.mubr.f32.gmra.mrb[14].mxu1 %v4557_v33 }
 0x3f4   :  { %v3783_v53 = vpop.f32.mrb[8].mxu1 }
 0x3f5   :  { %v1434_v55 = vmul.f32 %v3783_v53, %v4792_v25  ;;  %v1382_v56 = vpop.f32.mrb[9].mxu1  ;;  %v4240_v53 = vpack.c.bf16 %v1721_v51, %v1720_v49  ;;  %v2127_v49 = vld [vmem:[#allocation5 + $0xe0] sm:$0xff]  ;;  %v2128_v51 = vld [vmem:[#allocation5 + $0xe8] sm:$0xff] }
 0x3f6   :  { %v1433_v58 = vmul.f32 %v4792_v25, %v1382_v56 }
 0x3f7   :  { %v4868_v35 = vadd.f32 %v1443_v54, %v1434_v55  ;;  %v1850_v55 = vld [vmem:[#allocation5 + $0x38] sm:$0xff] }
 0x3f8   :  { %v3786_v57 = vpop.f32.mrb[10].mxu1  ;;  %v4870_v59 = vadd.f32 %v1443_v54, %v1433_v58  ;;  %v1939_v58 = vld [vmem:[#allocation5 + $0x40] sm:$0xff] }
 0x3f9   :  { %v1436_v63 = vmul.f32 %v3786_v57, %v4792_v25  ;;  %v1392_v4 = vpop.f32.mrb[11].mxu1  ;;  %v1454_v12 = vmax.f32 %v4868_v35, 0.0  ;;  %v1940_v35 = vld [vmem:[#allocation5 + $0x48] sm:$0xff] }
 0x3fa   :  { %v1435_v5 = vmul.f32 %v4792_v25, %v1392_v4  ;;  %v1453_v6 = vmax.f32 %v4870_v59, 0.0  ;;  %v4260_v57 = vpack.c.bf16 %v1940_v35, %v1939_v58  ;;  %v2214_v59 = vld [vmem:[%s5101_s5] sm:$0xff]  ;;  %v2216_v4 = vld [vmem:[%s5101_s5 + $0x10] sm:$0xff]  ;;  %v1934_v35 = vsub.s32 5, %v4623_v1 }
 0x3fb   :  { %v1448_v8 = vadd.f32 %v1443_v54, %v1436_v63  ;;  %v4911_v63 = vpack.c.bf16 %v2215_v60, %v2214_v59 }
 0x3fc   :  { %v1447_v10 = vadd.f32 %v1443_v54, %v1435_v5  ;;  %v3789_v13 = vpop.f32.mrb[12].mxu1  ;;  %3809 = vmatprep.mubr.msk.f32.mxu0 %vm249_vm2, %v1453_v6  ;;  %v2217_v5 = vld [vmem:[%s5101_s5 + $0x18] sm:$0xff] }
 0x3fd   :  { %v1438_v15 = vmul.f32 %v3789_v13, %v4792_v25  ;;  %v1402_v16 = vpop.f32.mrb[13].mxu1  ;;  %3810 = vmatmul.mubr.msk.f32.vlgmr.msra.gmra.mrb[16].mxu0 %vm249_vm2, %v1454_v12  ;;  %v1456_v62 = vmax.f32 %v1448_v8, 0.0 }
 0x3fe   :  { %v1455_v18 = vmax.f32 %v1447_v10, 0.0  ;;  %v1437_v19 = vmul.f32 %v4792_v25, %v1402_v16  ;;  %4215 = vmatpush3.bf16.msra.mxu0 %v4212_v39  ;;  %v1943_v16 = vld [vmem:[#allocation5 + $0x60] sm:$0xff] }
 0x3ff   :  { %v1450_v20 = vadd.f32 %v1443_v54, %v1438_v15  ;;  %4217 = vmatprep.subr.bf16.mxu0 %v4216_v9 }
 0x400   :  { %v1449_v22 = vadd.f32 %v1443_v54, %v1437_v19  ;;  %v3792_v23 = vpop.f32.mrb[14].mxu1  ;;  %3812 = vmatprep.mubr.msk.f32.mxu0 %vm249_vm2, %v1455_v18 }
 0x401   :  { %v1440_v27 = vmul.f32 %v3792_v23, %v4792_v25  ;;  %v1412_v29 = vpop.f32.mrb[15].mxu1  ;;  %3813 = vmatmul.mubr.msk.f32.gmra.mrb[18].mxu0 %vm249_vm2, %v1456_v62  ;;  %v1458_v11 = vmax.f32 %v1450_v20, 0.0 }
 0x402   :  { %v1457_v31 = vmax.f32 %v1449_v22, 0.0  ;;  %v1439_v7 = vmul.f32 %v4792_v25, %v1412_v29  ;;  %4219 = vmatpush3.bf16.msra.mxu0 %v4216_v9  ;;  %v1716_v25 = vld [vmem:[#allocation2 + $0x2d0] sm:$0xff]  ;;  %v1942_v9 = vld [vmem:[#allocation5 + $0x58] sm:$0xff] }
 0x403   :  { %v1452_v32 = vadd.f32 %v1443_v54, %v1440_v27  ;;  %4221 = vmatprep.subr.bf16.mxu0 %v4220_v21  ;;  %v4232_v47 = vpack.c.bf16 %v1717_v44, %v1716_v25  ;;  %v1946_v22 = vld [vmem:[#allocation5 + $0x78] sm:$0xff]  ;;  %v2032_v27 = vld [vmem:[#allocation5 + $0x88] sm:$0xff]  ;;  %v2123_v25 = vld [vmem:[#allocation5 + $0xc0] sm:$0xff] }
 0x404   :  { %v1451_v37 = vadd.f32 %v1443_v54, %v1439_v7  ;;  %3815 = vmatprep.mubr.msk.f32.mxu0 %vm249_vm2, %v1457_v31  ;;  %v1849_v54 = vld [vmem:[#allocation5 + $0x30] sm:$0xff]  ;;  %v2034_v7 = vld [vmem:[#allocation5 + $0x98] sm:$0xff] }
 0x405   :  { %3816 = vmatmul.mubr.msk.f32.gmra.mrb[20].mxu0 %vm249_vm2, %v1458_v11  ;;  %v1460_v41 = vmax.f32 %v1452_v32, 0.0  ;;  %v4256_v56 = vpack.c.bf16 %v1850_v55, %v1849_v54  ;;  %v2129_v54 = vld [vmem:[#allocation5 + $0xf0] sm:$0xff]  ;;  %v2130_v55 = vld [vmem:[#allocation5 + $0xf8] sm:$0xff] }
 0x406   :  { %v1459_v39 = vmax.f32 %v1451_v37, 0.0  ;;  %4223 = vmatpush3.bf16.msra.mxu0 %v4220_v21  ;;  %v2035_v37 = vld [vmem:[#allocation5 + $0xa0] sm:$0xff] }
 0x407   :  { %4225 = vmatprep.subr.bf16.mxu0 %v4224_v36  ;;  %4257 = vmatprep.subr.bf16.mxu1 %v4256_v56  ;;  %v4284_v42 = vpack.c.bf16 %v2036_v38, %v2035_v37 }
 0x408   :  { %3818 = vmatprep.mubr.msk.f32.mxu0 %vm249_vm2, %v1459_v39  ;;  %4259 = vmatpush3.bf16.msra.mxu1 %v4256_v56  ;;  %v4304_v56 = vpack.c.bf16 %v2130_v55, %v2129_v54 }
 0x409   :  { %3819 = vmatmul.mubr.msk.f32.gmra.mrb[22].mxu0 %vm249_vm2, %v1460_v41  ;;  %4261 = vmatprep.subr.bf16.mxu1 %v4260_v57 }
 0x40a   :  { %4227 = vmatpush3.bf16.msra.mxu0 %v4224_v36  ;;  %3837 = vmatprep.mubr.f32.mxu0 %v4557_v33 }
 0x40b   :  { %4229 = vmatprep.subr.bf16.mxu0 %v4228_v43 }
 0x40d   :  { %3838 = vmatmul.mubr.f32.vlgmr.msra.gmra.mrb[16].mxu0 %v4557_v33 }
 0x40e   :  { %4231 = vmatpush3.bf16.msra.mxu0 %v4228_v43  ;;  %3840 = vmatprep.mubr.msk.f32.mxu0 %vm249_vm2, %v1453_v6  ;;  %v4921_v6 = vpack.c.bf16 %v2217_v5, %v2216_v4 }
 0x40f   :  { %4233 = vmatprep.subr.bf16.mxu0 %v4232_v47 }
 0x411   :  { %3841 = vmatmul.mubr.msk.f32.gmra.mrb[18].mxu0 %vm249_vm2, %v1454_v12  ;;  %v1941_v12 = vld [vmem:[#allocation5 + $0x50] sm:$0xff] }
 0x412   :  { %4235 = vmatpush3.bf16.msra.mxu0 %v4232_v47  ;;  %3843 = vmatprep.mubr.msk.f32.mxu0 %vm249_vm2, %v1455_v18  ;;  %v4264_v14 = vpack.c.bf16 %v1942_v9, %v1941_v12  ;;  %v2126_v47 = vld [vmem:[#allocation5 + $0xd8] sm:$0xff]  ;;  %v2223_v12 = vand.u32 127, %v62_v0  ;;  %v4560_v9 = vmov 1.0  }
 0x413   :  { %4237 = vmatprep.subr.bf16.mxu0 %v4236_v50 }
 0x414   :  { %vm2224_vm4 = vcmp.lt.s32.totalorder %v2223_v12, 96 }
 0x415   :  { %3844 = vmatmul.mubr.msk.f32.gmra.mrb[20].mxu0 %vm249_vm2, %v1456_v62 }
 0x416   :  { %4239 = vmatpush3.bf16.msra.mxu0 %v4236_v50  ;;  %3846 = vmatprep.mubr.msk.f32.mxu0 %vm249_vm2, %v1457_v31 }
 0x417   :  { %4241 = vmatprep.subr.bf16.mxu0 %v4240_v53 }
 0x419   :  { %3847 = vmatmul.mubr.msk.f32.gmra.mrb[22].mxu0 %vm249_vm2, %v1458_v11 }
 0x41a   :  { %4243 = vmatpush3.bf16.msra.mxu0 %v4240_v53  ;;  %3865 = vmatprep.mubr.msk.f32.mxu0 %vm249_vm2, %v1455_v18  ;;  %v1944_v18 = vld [vmem:[#allocation5 + $0x68] sm:$0xff]  ;;  %v4300_v53 = vpack.c.bf16 %v2128_v51, %v2127_v49 }
 0x41b   :  { %4308 = vmatprep.subr.bf16.mxu0 %v4558_v61  ;;  %v4268_v20 = vpack.c.bf16 %v1944_v18, %v1943_v16 }
 0x41d   :  { %3866 = vmatmul.mubr.msk.f32.vlgmr.msra.gmra.mrb[16].mxu0 %vm249_vm2, %v1456_v62 }
 0x41e   :  { %3868 = vmatprep.mubr.msk.f32.mxu0 %vm249_vm2, %v1457_v31  ;;  %4310 = vmatpush3.bf16.msra.mxu0 %v4911_v63  ;;  %v4276_v31 = vpack.c.bf16 %v2032_v27, %v2031_v26 }
 0x41f   :  { %4311 = vmatprep.subr.bf16.mxu0 %v4558_v61 }
 0x421   :  { %3869 = vmatmul.mubr.msk.f32.gmra.mrb[18].mxu0 %vm249_vm2, %v1458_v11 }
 0x422   :  { %3871 = vmatprep.mubr.msk.f32.mxu0 %vm249_vm2, %v1459_v39  ;;  %4313 = vmatpush3.bf16.msra.mxu0 %v4921_v6  ;;  %v2037_v39 = vld [vmem:[#allocation5 + $0xb0] sm:$0xff] }
 0x423   :  { %4314 = vmatprep.subr.bf16.mxu0 %v4558_v61 }
 0x425   :  { %3872 = vmatmul.mubr.msk.f32.gmra.mrb[20].mxu0 %vm249_vm2, %v1460_v41  ;;  %v2038_v41 = vld [vmem:[#allocation5 + $0xb8] sm:$0xff] }
 0x426   :  { %3874 = vmatprep.mubr.f32.mxu0 %v4557_v33  ;;  %v4288_v43 = vpack.c.bf16 %v2038_v41, %v2037_v39 }
 0x429   :  { %3875 = vmatmul.mubr.f32.gmra.mrb[22].mxu0 %v4557_v33 }
 0x42a   :  { %3961 = vmatprep.mubr.msk.f32.mxu0 %vm4559_vm3, %v4557_v33 }
 0x42d   :  { %3962 = vmatmul.mubr.f32.vlgmr.msra.gmra.mrb[24].mxu0 %v4557_v33 }
 0x42e   :  { %4316 = vmatpush3.bf16.msra.mxu0 %v4911_v63  ;;  %3972 = vmatprep.mubr.msk.f32.mxu0 %vm4559_vm3, %v4557_v33 }
 0x42f   :  { %4317 = vmatprep.subr.bf16.mxu0 %v4558_v61 }
 0x432   :  { %4319 = vmatpush3.bf16.msra.mxu0 %v4921_v6 }
 0x433   :  { %4320 = vmatprep.subr.bf16.mxu0 %v4558_v61 }
 0x4f0   :  { %v3867_v8 = vpop.f32.mrb[16].mxu0 }
 0x4f1   :  { %v1788_v10 = vpop.f32.mrb[17].mxu0  ;;  %v1836_v17 = vadd.f32 %v3867_v8, %v4797_v28 }
 0x4f2   :  { %v1835_v13 = vadd.f32 %v1788_v10, %v4800_v30  ;;  %v1945_v30 = vld [vmem:[#allocation5 + $0x70] sm:$0xff]  ;;  %v4969_v10 = vsel %vm2224_vm4, 0.5, %v4560_v9 }
 0x4f3   :  { %v4272_v23 = vpack.c.bf16 %v1946_v22, %v1945_v30 }
 0x4f4   :  { %v3870_v15 = vpop.f32.mrb[18].mxu0  ;;  %3893 = vmatprep.mubr.msk.f32.mxu1 %vm249_vm2, %v1835_v13 }
 0x4f5   :  { %v1798_v19 = vpop.f32.mrb[19].mxu0  ;;  %3894 = vmatmul.mubr.msk.f32.vlgmr.msra.gmra.mrb[16].mxu1 %vm249_vm2, %v1836_v17  ;;  %v1838_v11 = vadd.f32 %v3870_v15, %v4807_v34  ;;  %v2124_v34 = vld [vmem:[#allocation5 + $0xc8] sm:$0xff]  ;;  %v4972_v17 = vsel %vm2224_vm4, 0.5, %v4557_v33 }
 0x4f6   :  { %v1837_v62 = vadd.f32 %v1798_v19, %v4812_v40  ;;  %4263 = vmatpush3.bf16.msra.mxu1 %v4260_v57  ;;  %v2033_v40 = vld [vmem:[#allocation5 + $0x90] sm:$0xff]  ;;  %v4292_v44 = vpack.c.bf16 %v2124_v34, %v2123_v25 }
 0x4f7   :  { %4265 = vmatprep.subr.bf16.mxu1 %v4264_v14  ;;  %v4280_v32 = vpack.c.bf16 %v2034_v7, %v2033_v40 }
 0x4f8   :  { %v3873_v21 = vpop.f32.mrb[20].mxu0  ;;  %3912 = vmatprep.mubr.msk.f32.mxu1 %vm249_vm2, %v1837_v62 }
 0x4f9   :  { %v1808_v28 = vpop.f32.mrb[21].mxu0  ;;  %v1840_v45 = vadd.f32 %v3873_v21, %v4822_v46 }
 0x4fa   :  { %4267 = vmatpush3.bf16.msra.mxu1 %v4264_v14  ;;  %v1839_v36 = vadd.f32 %v1808_v28, %v4826_v52  ;;  %v2125_v52 = vld [vmem:[#allocation5 + $0xd0] sm:$0xff] }
 0x4fb   :  { %4269 = vmatprep.subr.bf16.mxu1 %v4268_v20  ;;  %v4296_v48 = vpack.c.bf16 %v2126_v47, %v2125_v52 }
 0x4fc   :  { %v3876_v24 = vpop.f32.mrb[22].mxu0 }
 0x4fd   :  { %v1818_v29 = vpop.f32.mrb[23].mxu0  ;;  %v1842_v46 = vadd.f32 %v3876_v24, %v4835_v2  ;;  %v4960_v2 = vld [vmem:[%s5098_s2] sm:$0xff]  ;;  %s4561_s2 = smov 32  }
 0x4fe   :  { %4271 = vmatpush3.bf16.msra.mxu1 %v4268_v20  ;;  %v1841_v50 = vadd.f32 %v1818_v29, %v4838_v3  ;;  %v1935_v57 = vrot.slane %v4960_v2, %v1934_v35 }
 0x4ff   :  { %4273 = vmatprep.subr.bf16.mxu1 %v4272_v23 }
 0x500   :  { %v2296_v3 = vpop.f32.mrb[24].mxu0 }
 0x501   :  { %v3963_v58 = vpop.f32.mrb[25].mxu0 }
 0x502   :  { %4275 = vmatpush3.bf16.msra.mxu1 %v4272_v23 }
 0x503   :  { %4277 = vmatprep.subr.bf16.mxu1 %v4276_v31 }
 0x505   :  { %3913 = vmatmul.mubr.msk.f32.vlgmr.msra.gmra.mrb[16].mxu1 %vm249_vm2, %v1838_v11 }
 0x506   :  { %4279 = vmatpush3.bf16.msra.mxu1 %v4276_v31  ;;  %3931 = vmatprep.mubr.msk.f32.mxu1 %vm249_vm2, %v1839_v36 }
 0x507   :  { %4281 = vmatprep.subr.bf16.mxu1 %v4280_v32 }
 0x50a   :  { %4283 = vmatpush3.bf16.msra.mxu1 %v4280_v32 }
 0x50b   :  { %4285 = vmatprep.subr.bf16.mxu1 %v4284_v42 }
 0x50e   :  { %4287 = vmatpush3.bf16.msra.mxu1 %v4284_v42 }
 0x50f   :  { %4289 = vmatprep.subr.bf16.mxu1 %v4288_v43 }
 0x512   :  { %4291 = vmatpush3.bf16.msra.mxu1 %v4288_v43 }
 0x513   :  { %4293 = vmatprep.subr.bf16.mxu1 %v4292_v44 }
 0x515   :  { %3932 = vmatmul.mubr.msk.f32.vlgmr.msra.gmra.mrb[16].mxu1 %vm249_vm2, %v1840_v45 }
 0x516   :  { %4295 = vmatpush3.bf16.msra.mxu1 %v4292_v44  ;;  %3950 = vmatprep.mubr.msk.f32.mxu1 %vm249_vm2, %v1841_v50 }
 0x517   :  { %4297 = vmatprep.subr.bf16.mxu1 %v4296_v48 }
 0x51a   :  { %4299 = vmatpush3.bf16.msra.mxu1 %v4296_v48 }
 0x51b   :  { %4301 = vmatprep.subr.bf16.mxu1 %v4300_v53 }
 0x51e   :  { %4303 = vmatpush3.bf16.msra.mxu1 %v4300_v53 }
 0x51f   :  { %4305 = vmatprep.subr.bf16.mxu1 %v4304_v56 }
 0x522   :  { %4307 = vmatpush3.bf16.msra.mxu1 %v4304_v56 }
 0x523   :  { %4350 = vmatprep.subr.bf16.mxu1 %v4558_v61 }
 0x525   :  { %3951 = vmatmul.mubr.msk.f32.vlgmr.msra.gmra.mrb[16].mxu1 %vm249_vm2, %v1842_v46 }
 0x526   :  { %4352 = vmatpush3.bf16.msra.mxu1 %v4911_v63  ;;  %4038 = vmatprep.mubr.msk.f32.mxu1 %vm4559_vm3, %v4557_v33 }
 0x527   :  { %4353 = vmatprep.subr.bf16.mxu1 %v4558_v61 }
 0x52a   :  { %4355 = vmatpush3.bf16.msra.mxu1 %v4921_v6 }
 0x5f8   :  { %v3952_v59 = vpop.f32.mrb[16].mxu1 }
 0x5f9   :  { %v4963_v60 = vadd.f32 %v3952_v59, %v1935_v57  ;;  %v2203_v4 = vpop.f32.mrb[17].mxu1 }
 0x5fa   :  { %v4965_v5 = vadd.f32 %v2203_v4, %v1935_v57 }
 0x5fc   :  { %v2300_v8 = vadd.f32 %v4965_v5, %v2296_v3 }
 0x5fe   :  { %4445 = vtanh.f32 %v2300_v8 }
 0x608   :  { %v4446_v13 = vpop.eup %4445 }
 0x609   :  { %v2302_v14 = vmul.f32 %v4446_v13, %v4969_v10 }
 0x60b   :  { %v2303_v15 = vadd.f32 %v2302_v14, %v4972_v17 }
 0x60d   :  { %2306 = vrot.lane.b32.xlu0 %v2303_v15, %s4561_s2  ;;  %v2304_v0 = vmul.f32 0.0, %v2303_v15 }
 0x67f   :  { %v2307_v16 = vpop.permute.xlu0 %2306 }
 0x680   :  { %v2309_v18 = vmul.f32 %v2307_v16, %v2303_v15 }
 0x682   :  { %2311 = vrot.lane.b32.xlu1 %v2309_v18, %s4561_s2 }
 0x6f4   :  { %v2312_v19 = vpop.permute.xlu1 %2311 }
 0x6f5   :  { %v2314_v62 = vadd.f32 %v2312_v19, %v2304_v0 }
 0x6f7   :  { %4447 = vtanh.f32 %v2314_v62  ;;  %v2404_v11 = vrot.slane %v2314_v62, 6 }
 0x701   :  { %v4448_v20 = vpop.eup %4447 }
 0x702   :  { %2317 = vrot.lane.b32.xlu0 %v4448_v20, %s4561_s2 }
 0x774   :  { %v2318_v21 = vpop.permute.xlu0 %2317 }
 0x775   :  { %v2320_v30 = vmul.f32 %v2318_v21, %v2303_v15 }
 0x777   :  { %2322 = vrot.lane.b32.xlu1 %v2320_v30, %s4556_s10 }
 0x7e9   :  { %v2323_v22 = vpop.permute.xlu1 %2322 }
 0x7ea   :  { %3973 = vmatmul.mubr.msk.f32.vlgmr.msra.gmra.mrb[26].mxu0 %vm2227_vm5, %v2323_v22 }
 0x7eb   :  { %4322 = vmatpush3.bf16.msra.mxu0 %v4911_v63  ;;  %3983 = vmatprep.mubr.msk.f32.mxu0 %vm4559_vm3, %v4557_v33 }
 0x7ec   :  { %4323 = vmatprep.subr.bf16.mxu0 %v4558_v61 }
 0x7ef   :  { %4325 = vmatpush3.bf16.msra.mxu0 %v4921_v6 }
 0x7f0   :  { %4326 = vmatprep.subr.bf16.mxu0 %v4558_v61 }
 0x8bd   :  { %v2392_v28 = vpop.f32.mrb[26].mxu0 }
 0x8be   :  { %v2397_v23 = vrot.slane %v2392_v28, 6  ;;  %v3974_v24 = vpop.f32.mrb[27].mxu0 }
 0x8c0   :  { %v2399_v26 = vadd.f32 %v4965_v5, %v2397_v23 }
 0x8c2   :  { %4449 = vtanh.f32 %v2399_v26 }
 0x8cc   :  { %v4450_v27 = vpop.eup %4449 }
 0x8cd   :  { %v2401_v29 = vmul.f32 %v4450_v27, %v4969_v10 }
 0x8cf   :  { %v2402_v31 = vadd.f32 %v2401_v29, %v4972_v17 }
 0x8d1   :  { %2408 = vrot.lane.b32.xlu0 %v2402_v31, %s4561_s2  ;;  %v2406_v32 = vmul.f32 %v2404_v11, %v2402_v31 }
 0x943   :  { %v2409_v40 = vpop.permute.xlu0 %2408 }
 0x944   :  { %v2411_v7 = vmul.f32 %v2409_v40, %v2402_v31 }
 0x946   :  { %2413 = vrot.lane.b32.xlu1 %v2411_v7, %s4561_s2 }
 0x9b8   :  { %v2414_v36 = vpop.permute.xlu1 %2413 }
 0x9b9   :  { %v2416_v37 = vadd.f32 %v2414_v36, %v2406_v32 }
 0x9bb   :  { %4451 = vtanh.f32 %v2416_v37  ;;  %v2507_v51 = vrot.slane %v2416_v37, 6 }
 0x9c5   :  { %v4452_v38 = vpop.eup %4451 }
 0x9c6   :  { %2419 = vrot.lane.b32.xlu0 %v4452_v38, %s4561_s2 }
 0xa38   :  { %v2420_v42 = vpop.permute.xlu0 %2419 }
 0xa39   :  { %v2422_v39 = vmul.f32 %v2420_v42, %v2402_v31 }
 0xa3b   :  { %v2424_v41 = vrot.slane %v2422_v39, 2 }
 0xa3d   :  { %2425 = vrot.lane.b32.xlu1 %v2424_v41, %s4556_s10 }
 0xaaf   :  { %v2426_v43 = vpop.permute.xlu1 %2425 }
 0xab0   :  { %3984 = vmatmul.mubr.msk.f32.vlgmr.msra.gmra.mrb[28].mxu0 %vm2227_vm5, %v2426_v43 }
 0xab1   :  { %4328 = vmatpush3.bf16.msra.mxu0 %v4911_v63  ;;  %3994 = vmatprep.mubr.msk.f32.mxu0 %vm4559_vm3, %v4557_v33 }
 0xab2   :  { %4329 = vmatprep.subr.bf16.mxu0 %v4558_v61 }
 0xab5   :  { %4331 = vmatpush3.bf16.msra.mxu0 %v4921_v6 }
 0xab6   :  { %4332 = vmatprep.subr.bf16.mxu0 %v4558_v61 }
 0xb83   :  { %v2495_v25 = vpop.f32.mrb[28].mxu0 }
 0xb84   :  { %v2500_v34 = vrot.slane %v2495_v25, 4  ;;  %v3985_v44 = vpop.f32.mrb[29].mxu0 }
 0xb86   :  { %v2502_v52 = vadd.f32 %v4965_v5, %v2500_v34 }
 0xb88   :  { %4453 = vtanh.f32 %v2502_v52 }
 0xb92   :  { %v4454_v47 = vpop.eup %4453 }
 0xb93   :  { %v2504_v45 = vmul.f32 %v4454_v47, %v4969_v10 }
 0xb95   :  { %v2505_v48 = vadd.f32 %v2504_v45, %v4972_v17 }
 0xb97   :  { %2511 = vrot.lane.b32.xlu0 %v2505_v48, %s4561_s2  ;;  %v2509_v53 = vmul.f32 %v2507_v51, %v2505_v48 }
 0xc09   :  { %v2512_v50 = vpop.permute.xlu0 %2511 }
 0xc0a   :  { %v2514_v49 = vmul.f32 %v2512_v50, %v2505_v48 }
 0xc0c   :  { %2516 = vrot.lane.b32.xlu1 %v2514_v49, %s4561_s2 }
 0xc7e   :  { %v2517_v54 = vpop.permute.xlu1 %2516 }
 0xc7f   :  { %v2519_v55 = vadd.f32 %v2517_v54, %v2509_v53 }
 0xc81   :  { %4455 = vtanh.f32 %v2519_v55  ;;  %v2610_v16 = vrot.slane %v2519_v55, 6 }
 0xc8b   :  { %v4456_v56 = vpop.eup %4455 }
 0xc8c   :  { %2522 = vrot.lane.b32.xlu0 %v4456_v56, %s4561_s2 }
 0xcfe   :  { %v2523_v46 = vpop.permute.xlu0 %2522 }
 0xcff   :  { %v2525_v3 = vmul.f32 %v2523_v46, %v2505_v48 }
 0xd01   :  { %v2527_v58 = vrot.slane %v2525_v3, 4 }
 0xd03   :  { %2528 = vrot.lane.b32.xlu1 %v2527_v58, %s4556_s10 }
 0xd75   :  { %v2529_v35 = vpop.permute.xlu1 %2528 }
 0xd76   :  { %3995 = vmatmul.mubr.msk.f32.vlgmr.msra.gmra.mrb[30].mxu0 %vm2227_vm5, %v2529_v35 }
 0xd77   :  { %4334 = vmatpush3.bf16.msra.mxu0 %v4911_v63  ;;  %4005 = vmatprep.mubr.msk.f32.mxu0 %vm4559_vm3, %v4557_v33 }
 0xd78   :  { %4335 = vmatprep.subr.bf16.mxu0 %v4558_v61 }
 0xd7b   :  { %4337 = vmatpush3.bf16.msra.mxu0 %v4921_v6 }
 0xd7c   :  { %4338 = vmatprep.subr.bf16.mxu0 %v4558_v61 }
 0xe49   :  { %v2598_v57 = vpop.f32.mrb[30].mxu0 }
 0xe4a   :  { %v2603_v59 = vrot.slane %v2598_v57, 2  ;;  %v3996_v4 = vpop.f32.mrb[31].mxu0 }
 0xe4c   :  { %v2605_v8 = vadd.f32 %v4965_v5, %v2603_v59 }
 0xe4e   :  { %4457 = vtanh.f32 %v2605_v8 }
 0xe58   :  { %v4458_v12 = vpop.eup %4457 }
 0xe59   :  { %v2607_v9 = vmul.f32 %v4458_v12, %v4969_v10 }
 0xe5b   :  { %v2608_v13 = vadd.f32 %v2607_v9, %v4972_v17 }
 0xe5d   :  { %2614 = vrot.lane.b32.xlu0 %v2608_v13, %s4561_s2  ;;  %v2612_v18 = vmul.f32 %v2610_v16, %v2608_v13 }
 0xecf   :  { %v2615_v14 = vpop.permute.xlu0 %2614 }
 0xed0   :  { %v2617_v15 = vmul.f32 %v2615_v14, %v2608_v13 }
 0xed2   :  { %2619 = vrot.lane.b32.xlu1 %v2617_v15, %s4561_s2 }
 0xf44   :  { %v2620_v0 = vpop.permute.xlu1 %2619 }
 0xf45   :  { %v2622_v19 = vadd.f32 %v2620_v0, %v2612_v18 }
 0xf47   :  { %4459 = vtanh.f32 %v2622_v19  ;;  %v2710_v40 = vrot.slane %v2622_v19, 6 }
 0xf51   :  { %v4460_v62 = vpop.eup %4459 }
 0xf52   :  { %2625 = vrot.lane.b32.xlu0 %v4460_v62, %s4561_s2 }
 0xfc4   :  { %v2626_v5 = vpop.permute.xlu0 %2625 }
 0xfc5   :  { %v2628_v20 = vmul.f32 %v2626_v5, %v2608_v13 }
 0xfc7   :  { %v2630_v21 = vrot.slane %v2628_v20, 6 }
 0xfc9   :  { %2631 = vrot.lane.b32.xlu1 %v2630_v21, %s4556_s10 }
0x103b   :  { %v2632_v30 = vpop.permute.xlu1 %2631 }
0x103c   :  { %4006 = vmatmul.mubr.msk.f32.vlgmr.msra.gmra.mrb[32].mxu0 %vm2227_vm5, %v2632_v30 }
0x103d   :  { %4340 = vmatpush3.bf16.msra.mxu0 %v4911_v63  ;;  %4016 = vmatprep.mubr.msk.f32.mxu0 %vm4559_vm3, %v4557_v33 }
0x103e   :  { %4341 = vmatprep.subr.bf16.mxu0 %v4558_v61 }
0x1041   :  { %4343 = vmatpush3.bf16.msra.mxu0 %v4921_v6 }
0x1042   :  { %4344 = vmatprep.subr.bf16.mxu0 %v4558_v61 }
0x110f   :  { %v2701_v22 = vpop.f32.mrb[32].mxu0 }
0x1110   :  { %v2705_v28 = vadd.f32 %v4963_v60, %v2701_v22  ;;  %v4007_v23 = vpop.f32.mrb[33].mxu0 }
0x1112   :  { %4461 = vtanh.f32 %v2705_v28 }
0x111c   :  { %v4462_v24 = vpop.eup %4461 }
0x111d   :  { %v2707_v26 = vmul.f32 %v4462_v24, %v4969_v10 }
0x111f   :  { %v2708_v27 = vadd.f32 %v2707_v26, %v4972_v17 }
0x1121   :  { %2714 = vrot.lane.b32.xlu0 %v2708_v27, %s4561_s2  ;;  %v2712_v7 = vmul.f32 %v2710_v40, %v2708_v27  ;;  %v2221_v40 = vld [vmem:[%s5101_s5 + $0x38] sm:$0xff] }
0x1193   :  { %v2715_v29 = vpop.permute.xlu0 %2714 }
0x1194   :  { %v2717_v31 = vmul.f32 %v2715_v29, %v2708_v27 }
0x1196   :  { %2719 = vrot.lane.b32.xlu1 %v2717_v31, %s4561_s2 }
0x1208   :  { %v2720_v11 = vpop.permute.xlu1 %2719 }
0x1209   :  { %v2722_v32 = vadd.f32 %v2720_v11, %v2712_v7 }
0x120b   :  { %4463 = vtanh.f32 %v2722_v32 }
0x1215   :  { %v4464_v36 = vpop.eup %4463 }
0x1216   :  { %2725 = vrot.lane.b32.xlu0 %v4464_v36, %s4561_s2 }
0x1288   :  { %v2726_v37 = vpop.permute.xlu0 %2725 }
0x1289   :  { %v2728_v38 = vmul.f32 %v2726_v37, %v2708_v27 }
0x128b   :  { %2730 = vrot.lane.b32.xlu1 %v2728_v38, %s4556_s10 }
0x12fd   :  { %v2731_v42 = vpop.permute.xlu1 %2730 }
0x12fe   :  { %4017 = vmatmul.mubr.msk.f32.vlgmr.msra.gmra.mrb[34].mxu0 %vm2227_vm5, %v2731_v42  ;;  %v3039_v42 = vsub.s32 6, %v4623_v1 }
0x12ff   :  { %4346 = vmatpush3.bf16.msra.mxu0 %v4911_v63  ;;  %4027 = vmatprep.mubr.msk.f32.mxu0 %vm4559_vm3, %v4557_v33 }
0x1300   :  { %4347 = vmatprep.subr.bf16.mxu0 %v4558_v61 }
0x1303   :  { %4349 = vmatpush3.bf16.msra.mxu0 %v4921_v6  ;;  %v2812_v6 = vrot.slane %v2722_v32, 6 }
0x1304   :  { %4356 = vmatprep.subr.bf16.mxu0 %v4558_v61 }
0x13d1   :  { %v2800_v39 = vpop.f32.mrb[34].mxu0 }
0x13d2   :  { %v2805_v41 = vrot.slane %v2800_v39, 6  ;;  %v4018_v43 = vpop.f32.mrb[35].mxu0  ;;  %v3040_v39 = vrot.slane %v4960_v2, %v3039_v42 }
0x13d4   :  { %v2807_v25 = vadd.f32 %v4963_v60, %v2805_v41 }
0x13d6   :  { %4465 = vtanh.f32 %v2807_v25 }
0x13e0   :  { %v4466_v34 = vpop.eup %4465 }
0x13e1   :  { %v2809_v44 = vmul.f32 %v4466_v34, %v4969_v10 }
0x13e3   :  { %v2810_v63 = vadd.f32 %v2809_v44, %v4972_v17 }
0x13e5   :  { %2816 = vrot.lane.b32.xlu0 %v2810_v63, %s4561_s2  ;;  %v2814_v45 = vmul.f32 %v2812_v6, %v2810_v63 }
0x1457   :  { %v2817_v52 = vpop.permute.xlu0 %2816 }
0x1458   :  { %v2819_v47 = vmul.f32 %v2817_v52, %v2810_v63 }
0x145a   :  { %2821 = vrot.lane.b32.xlu1 %v2819_v47, %s4561_s2 }
0x14cc   :  { %v2822_v48 = vpop.permute.xlu1 %2821 }
0x14cd   :  { %v2824_v50 = vadd.f32 %v2822_v48, %v2814_v45 }
0x14cf   :  { %4467 = vtanh.f32 %v2824_v50  ;;  %v2915_v12 = vrot.slane %v2824_v50, 6 }
0x14d9   :  { %v4468_v49 = vpop.eup %4467 }
0x14da   :  { %2827 = vrot.lane.b32.xlu0 %v4468_v49, %s4561_s2 }
0x154c   :  { %v2828_v51 = vpop.permute.xlu0 %2827 }
0x154d   :  { %v2830_v53 = vmul.f32 %v2828_v51, %v2810_v63 }
0x154f   :  { %v2832_v54 = vrot.slane %v2830_v53, 2 }
0x1551   :  { %2833 = vrot.lane.b32.xlu1 %v2832_v54, %s4556_s10 }
0x15c3   :  { %v2834_v55 = vpop.permute.xlu1 %2833 }
0x15c4   :  { %4028 = vmatmul.mubr.msk.f32.vlgmr.msra.gmra.mrb[36].mxu0 %vm2227_vm5, %v2834_v55 }
0x15c5   :  { %4049 = vmatprep.mubr.msk.f32.mxu0 %vm4559_vm3, %v4557_v33 }
0x1697   :  { %v2903_v56 = vpop.f32.mrb[36].mxu0 }
0x1698   :  { %v2908_v46 = vrot.slane %v2903_v56, 4  ;;  %v4029_v3 = vpop.f32.mrb[37].mxu0 }
0x169a   :  { %v2910_v58 = vadd.f32 %v4963_v60, %v2908_v46 }
0x169c   :  { %4469 = vtanh.f32 %v2910_v58 }
0x16a6   :  { %v4470_v35 = vpop.eup %4469 }
0x16a7   :  { %v2912_v57 = vmul.f32 %v4470_v35, %v4969_v10 }
0x16a9   :  { %v2913_v59 = vadd.f32 %v2912_v57, %v4972_v17 }
0x16ab   :  { %2919 = vrot.lane.b32.xlu0 %v2913_v59, %s4561_s2  ;;  %v2917_v9 = vmul.f32 %v2915_v12, %v2913_v59 }
0x171d   :  { %v2920_v4 = vpop.permute.xlu0 %2919 }
0x171e   :  { %v2922_v8 = vmul.f32 %v2920_v4, %v2913_v59 }
0x1720   :  { %2924 = vrot.lane.b32.xlu1 %v2922_v8, %s4561_s2 }
0x1792   :  { %v2925_v33 = vpop.permute.xlu1 %2924 }
0x1793   :  { %v2927_v13 = vadd.f32 %v2925_v33, %v2917_v9 }
0x1795   :  { %4471 = vtanh.f32 %v2927_v13  ;;  %v3018_v24 = vrot.slane %v2927_v13, 6 }
0x179f   :  { %v4472_v14 = vpop.eup %4471 }
0x17a0   :  { %2930 = vrot.lane.b32.xlu0 %v4472_v14, %s4561_s2 }
0x1812   :  { %v2931_v15 = vpop.permute.xlu0 %2930 }
0x1813   :  { %v2933_v16 = vmul.f32 %v2931_v15, %v2913_v59 }
0x1815   :  { %v2935_v18 = vrot.slane %v2933_v16, 4 }
0x1817   :  { %2936 = vrot.lane.b32.xlu1 %v2935_v18, %s4556_s10 }
0x1889   :  { %v2937_v0 = vpop.permute.xlu1 %2936 }
0x188a   :  { %4039 = vmatmul.mubr.msk.f32.vlgmr.msra.gmra.mrb[18].mxu1 %vm2227_vm5, %v2937_v0 }
0x195d   :  { %v3006_v19 = vpop.f32.mrb[18].mxu1 }
0x195e   :  { %v3011_v62 = vrot.slane %v3006_v19, 2  ;;  %v4040_v5 = vpop.f32.mrb[19].mxu1 }
0x1960   :  { %v3013_v20 = vadd.f32 %v4963_v60, %v3011_v62  ;;  %v2218_v60 = vld [vmem:[%s5101_s5 + $0x20] sm:$0xff] }
0x1962   :  { %4473 = vtanh.f32 %v3013_v20 }
0x196c   :  { %v4474_v21 = vpop.eup %4473 }
0x196d   :  { %v3015_v30 = vmul.f32 %v4474_v21, %v4969_v10  ;;  %v2219_v10 = vld [vmem:[%s5101_s5 + $0x28] sm:$0xff] }
0x196e   :  { %v4357_v31 = vpack.c.bf16 %v2219_v10, %v2218_v60 }
0x196f   :  { %v3016_v22 = vadd.f32 %v3015_v30, %v4972_v17  ;;  %v2220_v17 = vld [vmem:[%s5101_s5 + $0x30] sm:$0xff]  ;;  %s4562_s5 = smov [#allocation7]  }
0x1970   :  { %4358 = vmatpush3.bf16.msra.mxu0 %v4357_v31  ;;  %v4360_v7 = vpack.c.bf16 %v2221_v40, %v2220_v17  ;;  %s3126_s7 = sshll.u32 %s4562_s5, 4  ;;  %s3127_s7 = int_to_ptr.vmem [resolvable:$true] %s3126_s7 }
0x1971   :  { %3022 = vrot.lane.b32.xlu0 %v3016_v22, %s4561_s2  ;;  %v3020_v26 = vmul.f32 %v3018_v24, %v3016_v22  ;;  %4359 = vmatprep.subr.bf16.mxu0 %v4558_v61  ;;  %s4524_s8 = scalar_lea.vmem %s3127_s7, 32  ;;  %p4529_p3 = scmp.lt.s32.totalorder %s3127_s7, %s3127_s7 }
0x1972   :  { %p4525_p2 = scmp.ne.s32.totalorder %s3127_s7, %s4524_s8  ;;  %p4530_p4 = scmp.lt.s32.totalorder %s4524_s8, %s4524_s8 }
0x1974   :  { %4361 = vmatpush3.bf16.msra.mxu0 %v4360_v7  ;;  %p4531_p5 = por %p4530_p4, %p4529_p3 }
0x1976   :  { %p4532_p6 = pnand %p4531_p5, %p4525_p2 }
0x19e3   :  { %v3023_v28 = vpop.permute.xlu0 %3022 }
0x19e4   :  { %v3025_v23 = vmul.f32 %v3023_v28, %v3016_v22 }
0x19e6   :  { %3027 = vrot.lane.b32.xlu1 %v3025_v23, %s4561_s2 }
0x1a58   :  { %v3028_v27 = vpop.permute.xlu1 %3027 }
0x1a59   :  { %v3030_v29 = vadd.f32 %v3028_v27, %v3020_v26 }
0x1a5b   :  { %4475 = vtanh.f32 %v3030_v29 }
0x1a65   :  { %v4476_v11 = vpop.eup %4475 }
0x1a66   :  { %3033 = vrot.lane.b32.xlu0 %v4476_v11, %s4561_s2 }
0x1ad8   :  { %v3034_v32 = vpop.permute.xlu0 %3033 }
0x1ad9   :  { %v3036_v36 = vmul.f32 %v3034_v32, %v3016_v22 }
0x1adb   :  { %v3042_v37 = vrot.slane %v3036_v36, 6 }
0x1add   :  { %3043 = vrot.lane.b32.xlu1 %v3042_v37, %s4556_s10 }
0x1b4f   :  { %v3044_v38 = vpop.permute.xlu1 %3043 }
0x1b50   :  { %4050 = vmatmul.mubr.msk.f32.vlgmr.msra.gmra.mrb[38].mxu0 %vm2227_vm5, %v3044_v38 }
0x1c23   :  { %v3113_v41 = vpop.f32.mrb[38].mxu0 }
0x1c24   :  { %v3114_v43 = vadd.f32 %v3113_v41, %v3040_v39  ;;  %v4051_v25 = vpop.f32.mrb[39].mxu0 }
0x1c26   :  { %4477 = vtanh.f32 %v3114_v43 }
0x1c30   :  { %v4478_v61 = vpop.eup %4477 }
0x1c31   :  { %3119 = vst.msk [vmem:[#allocation7] sm:$0x3] %vm3118_vm6, %v4478_v61 }
0x1c32   :  { %4535 = shalt.err (!%p4532_p6)
}
0x1c33   :  { %s4536_s11 = scalar_lea.hbm %s5102_s6, 32 }
0x1c34   :  { %p4537_p7 = scmp.ne.s32.totalorder %s5102_s6, %s4536_s11  ;;  %p4540_p8 = scmp.lt.u32.totalorder %s4536_s11, %s5102_s6 }
0x1c36   :  { %p4542_p9 = pnand %p4540_p8, %p4537_p7 }
0x1c38   :  { %4545 = shalt.err (!%p4542_p9)
}
0x1c39   :  { %3129 = dma.vmem_to_hbm [thread:$0]  %s3127_s7, 32, %s5102_s6, [#allocation4]  }
0x1c3a   :  { %4550 = dma.done.wait [#allocation4], 32  }
0x1c3b   :  { %4551 = vsyncadd [#allocation4], 4294967264 }
0x1c3c   :  { %3133 = vsyncpa [#allocation3], 1 }
0x1c3d   :  { %3134 = vsyncpa [#allocation6], 1 }
0x1c3e   :  { %3135 = vsyncpa [#allocation4], 1 }

</bundles_post_ra>
